<compile_context>
chip_gen: v7x
topology: tpu7x:2x2x1
jax: 0.10.0
libtpu: 0.0.40
codegen_flags: <defaults>
</compile_context>

<pallas_src>
import jax
import jax.numpy as jnp
from jax.experimental import pallas as pl
from jax.experimental.pallas import tpu as pltpu


def _mul_conv1x1_kernel(x_ref, s_ref, w_ref, o_ref):
    # x_ref: (Cin, HW)       activation rows for batch n (NCHW-native, no transpose)
    # s_ref: (1,  Cin)       per-channel scale for batch n
    # w_ref: (tile_co, Cin)  Cout-tile of the 1x1 conv weight
    # o_ref: (tile_co, HW)
    w_scaled = w_ref[...] * s_ref[...]                  # fold scale into weight (VPU)
    o_ref[...] = jnp.dot(                               # 1x1 conv == matmul (MXU)
        w_scaled, x_ref[...], preferred_element_type=jnp.float32
    ).astype(o_ref.dtype)


def _num_tensorcores() -> int:
    # v7x exposes 2 TensorCores per chip; v5e/v6e have 1.  Defensive default = 1.
    try:
        kind = jax.devices()[0].device_kind.lower()
    except Exception:
        return 1
    return 2 if "7" in kind else 1


def _pick_cout_tile(cout: int, n_tc: int) -> int:
    # The op is tiny (~1 MB HBM traffic, ~44 MFLOP): per-grid-step overhead
    # dominates, so never create more Cout tiles than there are TensorCores.
    # -> 1 tile on v5e/v6e, 2 (one per TC, sublane-aligned) on v7x.
    if n_tc > 1 and cout % n_tc == 0 and (cout // n_tc) % 8 == 0:
        return cout // n_tc
    return cout


def mul_conv1x1(scale_nc11, x_nchw, weight_oi11):
    """out = Conv2d(Cin, Cout, 1, bias=False)(scale * x), all in NCHW."""
    N, C, H, W = x_nchw.shape
    Cout, Cin, kh, kw = weight_oi11.shape
    assert (kh, kw) == (1, 1) and Cin == C
    assert scale_nc11.shape == (N, C, 1, 1)

    HW = H * W
    x_rows = x_nchw.reshape(N, C, HW)        # free: NCHW is contiguous over (H,W)
    s_rows = scale_nc11.reshape(N, 1, C)     # free: same element order
    w2d = weight_oi11.reshape(Cout, Cin)     # free

    tile_co = _pick_cout_tile(Cout, _num_tensorcores())
    n_co = Cout // tile_co

    # Accurate (tiny) cost hint so XLA can overlap neighbouring ops in a model.
    cost = pl.CostEstimate(
        flops=2 * N * Cout * Cin * HW,
        transcendentals=0,
        bytes_accessed=4 * (N * Cin * HW + Cout * Cin + N * Cin + N * Cout * HW),
    )

    # Grid: (Cout tiles, batch).  Weight index depends only on j -> resident
    # across the batch axis (DMA'd once total).  Activation/scale depend only
    # on n; for N == 1 they stay resident across the Cout tiles as well.
    out = pl.pallas_call(
        _mul_conv1x1_kernel,
        out_shape=jax.ShapeDtypeStruct((N, Cout, HW), x_nchw.dtype),
        grid=(n_co, N),
        in_specs=[
            pl.BlockSpec((None, C, HW), lambda j, n: (n, 0, 0)),    # activation
            pl.BlockSpec((None, 1, C), lambda j, n: (n, 0, 0)),     # per-batch scale
            pl.BlockSpec((tile_co, Cin), lambda j, n: (j, 0)),      # weight tile
        ],
        out_specs=pl.BlockSpec((None, tile_co, HW), lambda j, n: (n, j, 0)),
        compiler_params=pltpu.CompilerParams(
            # every (j, n) writes a disjoint output block -> both axes parallel
            # (lets v7x split the 2 Cout tiles across its two TensorCores)
            dimension_semantics=("parallel", "parallel"),
        ),
        cost_estimate=cost,
    )(x_rows, s_rows, w2d)

    return out.reshape(N, Cout, H, W)        # free: no transpose needed


if __name__ == "__main__":
    key = jax.random.PRNGKey(0)
    k_x, k_s, k_w = jax.random.split(key, 3)

    # Shapes from the module: x159 (1,336,14,14), x164 (1,336,1,1), Conv2d(336,336,1)
    N, C, H, W = 1, 336, 14, 14
    x159 = jax.random.normal(k_x, (N, C, H, W), dtype=jnp.float32)
    x164 = jax.random.normal(k_s, (N, C, 1, 1), dtype=jnp.float32)
    weight = jax.random.normal(k_w, (C, C, 1, 1), dtype=jnp.float32) * 0.05

    out = jax.jit(mul_conv1x1)(x164, x159, weight)
    jax.block_until_ready(out)

    # sanity check against plain-JAX reference (x164 * x159, then 1x1 conv)
    ref = jnp.einsum("nchw,oc->nohw", x164 * x159, weight.reshape(C, C))
    assert out.shape == (N, C, H, W)
    max_err = float(jnp.max(jnp.abs(out - ref)))
    assert jnp.allclose(out, ref, atol=2e-3, rtol=2e-3), max_err

    print("KERNEL_OK")
</pallas_src>

<mosaic_0001>
module attributes {stable_mosaic.version = 11 : i64} {
  func.func @_mul_conv1x1_kernel(%arg0: i32, %arg1: i32, %arg2: memref<1x336x196xf32, #tpu.memory_space<vmem>>, %arg3: memref<1x1x336xf32, #tpu.memory_space<vmem>>, %arg4: memref<336x336xf32, #tpu.memory_space<vmem>>, %arg5: memref<1x336x196xf32, #tpu.memory_space<vmem>>) attributes {dimension_semantics = [#tpu.dimension_semantics<parallel>, #tpu.dimension_semantics<parallel>], iteration_bounds = array<i64: 1, 1>, scalar_prefetch = 0 : i64, scratch_operands = 0 : i64, tpu.core_type = #tpu.core_type<tc>, window_params = [{transform_indices = @transform_0, window_bounds = array<i64: 1, 336, 196>}, {transform_indices = @transform_1, window_bounds = array<i64: 1, 1, 336>}, {transform_indices = @transform_2, window_bounds = array<i64: 336, 336>}, {transform_indices = @transform_3, window_bounds = array<i64: 1, 336, 196>}]} {
    %c0 = arith.constant 0 : index
    %c0_0 = arith.constant 0 : index
    %0 = vector.load %arg4[%c0, %c0_0] : memref<336x336xf32, #tpu.memory_space<vmem>>, vector<336x336xf32>
    %c0_1 = arith.constant 0 : index
    %c0_2 = arith.constant 0 : index
    %c0_3 = arith.constant 0 : index
    %1 = vector.load %arg3[%c0_1, %c0_2, %c0_3] : memref<1x1x336xf32, #tpu.memory_space<vmem>>, vector<1x1x336xf32>
    %2 = vector.shape_cast %1 : vector<1x1x336xf32> to vector<1x336xf32>
    %3 = vector.broadcast %2 : vector<1x336xf32> to vector<336x336xf32>
    %4 = arith.mulf %0, %3 : vector<336x336xf32>
    %c0_4 = arith.constant 0 : index
    %c0_5 = arith.constant 0 : index
    %c0_6 = arith.constant 0 : index
    %5 = vector.load %arg2[%c0_4, %c0_5, %c0_6] : memref<1x336x196xf32, #tpu.memory_space<vmem>>, vector<1x336x196xf32>
    %6 = vector.shape_cast %5 : vector<1x336x196xf32> to vector<336x196xf32>
    %cst = arith.constant dense<0.000000e+00> : vector<336x196xf32>
    %7 = tpu.matmul %4, %6, %cst {dimension_numbers = #tpu.dot_dimension_numbers<[1], [0], [0], [1], [0, 0, 1, 1], [], []>} : vector<336x336xf32>, vector<336x196xf32>, vector<336x196xf32> -> vector<336x196xf32>
    %c0_7 = arith.constant 0 : index
    %c0_8 = arith.constant 0 : index
    %c0_9 = arith.constant 0 : index
    %8 = vector.load %arg5[%c0_7, %c0_8, %c0_9] : memref<1x336x196xf32, #tpu.memory_space<vmem>>, vector<1x336x196xf32>
    %9 = vector.shape_cast %8 : vector<1x336x196xf32> to vector<336x196xf32>
    %10 = vector.shape_cast %7 : vector<336x196xf32> to vector<1x336x196xf32>
    tpu.vector_store %arg5[%c0_7, %c0_8, %c0_9], %10 {strides = array<i32>} : memref<1x336x196xf32, #tpu.memory_space<vmem>>, vector<1x336x196xf32>,
    return
  }
  func.func @transform_0(%arg0: i32, %arg1: i32) -> (i32, i32, i32) {
    %c0_i32 = arith.constant 0 : i32
    %c0_i32_0 = arith.constant 0 : i32
    %c0_i32_1 = arith.constant 0 : i32
    return %arg1, %c0_i32, %c0_i32_0 : i32, i32, i32
  }
  func.func @transform_1(%arg0: i32, %arg1: i32) -> (i32, i32, i32) {
    %c0_i32 = arith.constant 0 : i32
    %c0_i32_0 = arith.constant 0 : i32
    %c0_i32_1 = arith.constant 0 : i32
    return %arg1, %c0_i32, %c0_i32_0 : i32, i32, i32
  }
  func.func @transform_2(%arg0: i32, %arg1: i32) -> (i32, i32) {
    %c0_i32 = arith.constant 0 : i32
    %c0_i32_0 = arith.constant 0 : i32
    return %arg0, %c0_i32 : i32, i32
  }
  func.func @transform_3(%arg0: i32, %arg1: i32) -> (i32, i32, i32) {
    %c0_i32 = arith.constant 0 : i32
    %c0_i32_0 = arith.constant 0 : i32
    return %arg1, %arg0, %c0_i32 : i32, i32, i32
  }
}

</mosaic_0001>

<bundles_post_ra>
// kernel: mul_conv1x1.1
= control target key start
LH: loop header
LB: loop body
LE: loop exit
PB: predicated region body
PF: predicated region fallthrough
CT: control target
= control target key end

     0   :  { %v1428_v3 = vmov 0.0   ;;  %v142_v44 = vlaneseq  ;;  %vm367_vm0 = vcmask 654336   ;;  %vm1129_vm1 = vcmask 556032   ;;  %s2602_s0 = inlined_call_operand.vmem [shape: f32[1,336,196], index: 0, kind: input, shape index: {}]   ;;  %s2603_s1 = inlined_call_operand.vmem [shape: f32[1,1,336], index: 1, kind: input, shape index: {}]   ;;  %s2604_s2 = inlined_call_operand.vmem [shape: f32[336,336], index: 2, kind: input, shape index: {}]   ;;  %s2605_s3 = inlined_call_operand.vmem [shape: f32[1,336,196], index: 3, kind: output, shape index: {}]  }
   0x1   :  { %v284_v0 = vld [vmem:[%s2602_s0 + $0x8] sm:$0xff]  ;;  %v286_v1 = vld [vmem:[%s2602_s0 + $0x18] sm:$0xff]  ;;  %v283_v2 = vld [vmem:[%s2602_s0] sm:$0xff]  ;;  %875 = vmatprep.mubr.f32.mxu0 %v1428_v3 }
   0x2   :  { %v1259_v4 = vpack.c.bf16 %v286_v1, %v284_v0  ;;  %v285_v5 = vld [vmem:[%s2602_s0 + $0x10] sm:$0xff]  ;;  %v288_v6 = vld [vmem:[%s2602_s0 + $0x28] sm:$0xff]  ;;  %v290_v7 = vld [vmem:[%s2602_s0 + $0x38] sm:$0xff]  ;;  %v1570_v60 = vshrl.u32 %v142_v44, 7 }
   0x3   :  { %v1261_v8 = vpack.c.bf16 %v285_v5, %v283_v2  ;;  %v1263_v9 = vpack.c.bf16 %v290_v7, %v288_v6  ;;  %v287_v10 = vld [vmem:[%s2602_s0 + $0x20] sm:$0xff]  ;;  %v289_v11 = vld [vmem:[%s2602_s0 + $0x30] sm:$0xff]  ;;  %v292_v12 = vld [vmem:[%s2602_s0 + $0x48] sm:$0xff] }
   0x4   :  { %1260 = vmatprep.subr.bf16.mxu1 %v1259_v4  ;;  %v294_v13 = vld [vmem:[%s2602_s0 + $0x58] sm:$0xff]  ;;  %v1265_v14 = vpack.c.bf16 %v289_v11, %v287_v10  ;;  %v291_v16 = vld [vmem:[%s2602_s0 + $0x40] sm:$0xff]  ;;  %v293_v17 = vld [vmem:[%s2602_s0 + $0x50] sm:$0xff] }
   0x5   :  { %1262 = vmatpush1.bf16.msra.mxu1 %v1261_v8  ;;  %v1267_v15 = vpack.c.bf16 %v294_v13, %v292_v12  ;;  %v296_v18 = vld [vmem:[%s2602_s0 + $0x68] sm:$0xff]  ;;  %v298_v19 = vld [vmem:[%s2602_s0 + $0x78] sm:$0xff]  ;;  %v1269_v20 = vpack.c.bf16 %v293_v17, %v291_v16  ;;  %v295_v22 = vld [vmem:[%s2602_s0 + $0x60] sm:$0xff]  ;;  %v148_v12 = vsub.s32 1, %v1570_v60 }
   0x6   :  { %1264 = vmatprep.subr.bf16.mxu1 %v1263_v9  ;;  %v1271_v21 = vpack.c.bf16 %v298_v19, %v296_v18  ;;  %v297_v23 = vld [vmem:[%s2602_s0 + $0x70] sm:$0xff]  ;;  %v300_v24 = vld [vmem:[%s2602_s0 + $0x88] sm:$0xff]  ;;  %v302_v25 = vld [vmem:[%s2602_s0 + $0x98] sm:$0xff] }
   0x7   :  { %v1273_v26 = vpack.c.bf16 %v297_v23, %v295_v22  ;;  %v1275_v27 = vpack.c.bf16 %v302_v25, %v300_v24  ;;  %v299_v28 = vld [vmem:[%s2602_s0 + $0x80] sm:$0xff]  ;;  %v301_v29 = vld [vmem:[%s2602_s0 + $0x90] sm:$0xff]  ;;  %v304_v30 = vld [vmem:[%s2602_s0 + $0xa8] sm:$0xff] }
   0x8   :  { %v306_v31 = vld [vmem:[%s2602_s0 + $0xb8] sm:$0xff]  ;;  %v348_v32 = vld [vmem:[%s2602_s0 + $0x208] sm:$0xff]  ;;  %v1277_v34 = vpack.c.bf16 %v301_v29, %v299_v28  ;;  %v303_v35 = vld [vmem:[%s2602_s0 + $0xa0] sm:$0xff] }
   0x9   :  { %1266 = vmatpush1.bf16.msra.mxu1 %v1265_v14  ;;  %v350_v33 = vld [vmem:[%s2602_s0 + $0x218] sm:$0xff]  ;;  %v347_v37 = vld [vmem:[%s2602_s0 + $0x200] sm:$0xff]  ;;  %v349_v38 = vld [vmem:[%s2602_s0 + $0x210] sm:$0xff]  ;;  %v1279_v39 = vpack.c.bf16 %v306_v31, %v304_v30 }
   0xa   :  { %1268 = vmatprep.subr.bf16.mxu1 %v1267_v15  ;;  %v1323_v36 = vpack.c.bf16 %v350_v33, %v348_v32  ;;  %v305_v40 = vld [vmem:[%s2602_s0 + $0xb0] sm:$0xff]  ;;  %v1325_v41 = vpack.c.bf16 %v349_v38, %v347_v37  ;;  %v352_v42 = vld [vmem:[%s2602_s0 + $0x228] sm:$0xff]  ;;  %v354_v43 = vld [vmem:[%s2602_s0 + $0x238] sm:$0xff]  ;;  %v152_v15 = vsub.s32 2, %v1570_v60 }
   0xb   :  { %v308_v45 = vld [vmem:[%s2602_s0 + $0xc8] sm:$0xff]  ;;  %v310_v46 = vld [vmem:[%s2602_s0 + $0xd8] sm:$0xff]  ;;  %v1327_v47 = vpack.c.bf16 %v354_v43, %v352_v42  ;;  %v351_v48 = vld [vmem:[%s2602_s0 + $0x220] sm:$0xff]  ;;  %v1281_v50 = vpack.c.bf16 %v305_v40, %v303_v35 }
   0xc   :  { %1324 = vmatprep.subr.bf16.mxu0 %v1323_v36  ;;  %v353_v49 = vld [vmem:[%s2602_s0 + $0x230] sm:$0xff]  ;;  %v307_v51 = vld [vmem:[%s2602_s0 + $0xc0] sm:$0xff]  ;;  %v356_v53 = vld [vmem:[%s2602_s0 + $0x248] sm:$0xff]  ;;  %v1283_v55 = vpack.c.bf16 %v310_v46, %v308_v45 }
   0xd   :  { %1270 = vmatpush1.bf16.msra.mxu1 %v1269_v20  ;;  %1326 = vmatpush1.bf16.msra.mxu0 %v1325_v41  ;;  %v1329_v52 = vpack.c.bf16 %v353_v49, %v351_v48  ;;  %v358_v54 = vld [vmem:[%s2602_s0 + $0x258] sm:$0xff]  ;;  %v309_v56 = vld [vmem:[%s2602_s0 + $0xd0] sm:$0xff]  ;;  %v355_v58 = vld [vmem:[%s2602_s0 + $0x240] sm:$0xff] }
   0xe   :  { %1272 = vmatprep.subr.bf16.mxu1 %v1271_v21  ;;  %1328 = vmatprep.subr.bf16.mxu0 %v1327_v47  ;;  %v1331_v57 = vpack.c.bf16 %v358_v54, %v356_v53  ;;  %v357_v59 = vld [vmem:[%s2602_s0 + $0x250] sm:$0xff]  ;;  %v312_v61 = vld [vmem:[%s2602_s0 + $0xe8] sm:$0xff]  ;;  %v314_v62 = vld [vmem:[%s2602_s0 + $0xf8] sm:$0xff]  ;;  %v1285_v2 = vpack.c.bf16 %v309_v56, %v307_v51 }
   0xf   :  { %v360_v63 = vld [vmem:[%s2602_s0 + $0x268] sm:$0xff]  ;;  %v1333_v0 = vpack.c.bf16 %v357_v59, %v355_v58  ;;  %v362_v1 = vld [vmem:[%s2602_s0 + $0x278] sm:$0xff]  ;;  %v311_v4 = vld [vmem:[%s2602_s0 + $0xe0] sm:$0xff]  ;;  %v1287_v8 = vpack.c.bf16 %v314_v62, %v312_v61 }
  0x10   :  { %v1335_v5 = vpack.c.bf16 %v362_v1, %v360_v63  ;;  %v359_v6 = vld [vmem:[%s2602_s0 + $0x260] sm:$0xff]  ;;  %v361_v7 = vld [vmem:[%s2602_s0 + $0x270] sm:$0xff]  ;;  %v364_v10 = vld [vmem:[%s2602_s0 + $0x288] sm:$0xff] }
  0x11   :  { %1274 = vmatpush1.bf16.msra.mxu1 %v1273_v26  ;;  %1330 = vmatpush1.bf16.msra.mxu0 %v1329_v52  ;;  %v313_v9 = vld [vmem:[%s2602_s0 + $0xf0] sm:$0xff]  ;;  %v366_v11 = vld [vmem:[%s2602_s0 + $0x298] sm:$0xff]  ;;  %v316_v13 = vld [vmem:[%s2602_s0 + $0x108] sm:$0xff]  ;;  %v1337_v16 = vpack.c.bf16 %v361_v7, %v359_v6 }
  0x12   :  { %1276 = vmatprep.subr.bf16.mxu1 %v1275_v27  ;;  %1332 = vmatprep.subr.bf16.mxu0 %v1331_v57  ;;  %v318_v14 = vld [vmem:[%s2602_s0 + $0x118] sm:$0xff]  ;;  %v363_v17 = vld [vmem:[%s2602_s0 + $0x280] sm:$0xff]  ;;  %v1289_v18 = vpack.c.bf16 %v313_v9, %v311_v4  ;;  %v1339_v19 = vpack.c.bf16 %v366_v11, %v364_v10  ;;  %v365_v20 = vld [vmem:[%s2602_s0 + $0x290] sm:$0xff] }
  0x13   :  { %v15_v21 = vld [vmem:[%s2604_s2 + $0x8] sm:$0xff]  ;;  %v1622_v22 = vld [vmem:[%s2603_s1] sm:$0x7]  ;;  %v1291_v23 = vpack.c.bf16 %v318_v14, %v316_v13  ;;  %v317_v25 = vld [vmem:[%s2602_s0 + $0x110] sm:$0xff]  ;;  %v1341_v30 = vpack.c.bf16 %v365_v20, %v363_v17 }
  0x14   :  { %v315_v24 = vld [vmem:[%s2602_s0 + $0x100] sm:$0xff]  ;;  %v1631_v26 = vrot.slane %v1622_v22, %v148_v12  ;;  %v320_v27 = vld [vmem:[%s2602_s0 + $0x128] sm:$0xff]  ;;  %v322_v28 = vld [vmem:[%s2602_s0 + $0x138] sm:$0xff]  ;;  %v1640_v29 = vrot.slane %v1622_v22, %v152_v15 }
  0x15   :  { %1278 = vmatpush1.bf16.msra.mxu1 %v1277_v34  ;;  %1334 = vmatpush1.bf16.msra.mxu0 %v1333_v0  ;;  %v16_v32 = vld [vmem:[%s2604_s2 + $0x10] sm:$0xff]  ;;  %v1293_v33 = vpack.c.bf16 %v317_v25, %v315_v24  ;;  %v1295_v34 = vpack.c.bf16 %v322_v28, %v320_v27  ;;  %v319_v35 = vld [vmem:[%s2602_s0 + $0x120] sm:$0xff]  ;;  %v324_v37 = vld [vmem:[%s2602_s0 + $0x148] sm:$0xff] }
  0x16   :  { %1280 = vmatprep.subr.bf16.mxu1 %v1279_v39  ;;  %1336 = vmatprep.subr.bf16.mxu0 %v1335_v5  ;;  %v158_v31 = vmul.f32 %v1631_v26, %v15_v21  ;;  %v321_v36 = vld [vmem:[%s2602_s0 + $0x130] sm:$0xff]  ;;  %v326_v38 = vld [vmem:[%s2602_s0 + $0x158] sm:$0xff]  ;;  %v159_v39 = vmul.f32 %v1640_v29, %v16_v32  ;;  %v19_v40 = vld [vmem:[%s2604_s2 + $0x28] sm:$0xff] }
  0x17   :  { %v1297_v41 = vpack.c.bf16 %v321_v36, %v319_v35  ;;  %v1299_v42 = vpack.c.bf16 %v326_v38, %v324_v37  ;;  %v323_v43 = vld [vmem:[%s2602_s0 + $0x140] sm:$0xff]  ;;  %v325_v44 = vld [vmem:[%s2602_s0 + $0x150] sm:$0xff]  ;;  %v328_v45 = vld [vmem:[%s2602_s0 + $0x168] sm:$0xff]  ;;  %v162_v47 = vmul.f32 %v1640_v29, %v19_v40 }
  0x18   :  { %558 = vmatprep.mubr.f32.mxu1 %v158_v31  ;;  %v330_v46 = vld [vmem:[%s2602_s0 + $0x178] sm:$0xff]  ;;  %v22_v48 = vld [vmem:[%s2604_s2 + $0x40] sm:$0xff]  ;;  %v1301_v49 = vpack.c.bf16 %v325_v44, %v323_v43  ;;  %v329_v52 = vld [vmem:[%s2602_s0 + $0x170] sm:$0xff] }
  0x19   :  { %1282 = vmatpush1.bf16.msra.mxu1 %v1281_v50  ;;  %1338 = vmatpush1.bf16.msra.mxu0 %v1337_v16  ;;  %v1303_v50 = vpack.c.bf16 %v330_v46, %v328_v45  ;;  %v327_v51 = vld [vmem:[%s2602_s0 + $0x160] sm:$0xff]  ;;  %v332_v53 = vld [vmem:[%s2602_s0 + $0x188] sm:$0xff]  ;;  %v334_v54 = vld [vmem:[%s2602_s0 + $0x198] sm:$0xff] }
  0x1a   :  { %1284 = vmatprep.subr.bf16.mxu1 %v1283_v55  ;;  %1340 = vmatprep.subr.bf16.mxu0 %v1339_v19  ;;  %v165_v55 = vmul.f32 %v1640_v29, %v22_v48  ;;  %v25_v56 = vld [vmem:[%s2604_s2 + $0x58] sm:$0xff]  ;;  %v1305_v57 = vpack.c.bf16 %v329_v52, %v327_v51  ;;  %v1307_v58 = vpack.c.bf16 %v334_v54, %v332_v53  ;;  %v331_v59 = vld [vmem:[%s2602_s0 + $0x180] sm:$0xff]  ;;  %v333_v61 = vld [vmem:[%s2602_s0 + $0x190] sm:$0xff] }
  0x1b   :  { %v336_v62 = vld [vmem:[%s2602_s0 + $0x1a8] sm:$0xff]  ;;  %v338_v63 = vld [vmem:[%s2602_s0 + $0x1b8] sm:$0xff]  ;;  %v168_v0 = vmul.f32 %v1640_v29, %v25_v56  ;;  %v28_v1 = vld [vmem:[%s2604_s2 + $0x70] sm:$0xff] }
  0x1c   :  { %v1311_v4 = vpack.c.bf16 %v338_v63, %v336_v62  ;;  %v335_v5 = vld [vmem:[%s2602_s0 + $0x1a0] sm:$0xff]  ;;  %v337_v6 = vld [vmem:[%s2602_s0 + $0x1b0] sm:$0xff]  ;;  %v340_v7 = vld [vmem:[%s2602_s0 + $0x1c8] sm:$0xff]  ;;  %v171_v9 = vmul.f32 %v1640_v29, %v28_v1 }
  0x1d   :  { %1286 = vmatpush1.bf16.msra.mxu1 %v1285_v2  ;;  %1342 = vmatpush1.bf16.msra.mxu0 %v1341_v30  ;;  %v1309_v2 = vpack.c.bf16 %v333_v61, %v331_v59  ;;  %v31_v10 = vld [vmem:[%s2604_s2 + $0x88] sm:$0xff]  ;;  %v1313_v11 = vpack.c.bf16 %v337_v6, %v335_v5  ;;  %v339_v13 = vld [vmem:[%s2602_s0 + $0x1c0] sm:$0xff]  ;;  %v341_v14 = vld [vmem:[%s2602_s0 + $0x1d0] sm:$0xff] }
  0x1e   :  { %1288 = vmatprep.subr.bf16.mxu1 %v1287_v8  ;;  %v342_v8 = vld [vmem:[%s2602_s0 + $0x1d8] sm:$0xff]  ;;  %v344_v15 = vld [vmem:[%s2602_s0 + $0x1e8] sm:$0xff]  ;;  %v174_v17 = vmul.f32 %v1640_v29, %v31_v10  ;;  %v34_v19 = vld [vmem:[%s2604_s2 + $0xa0] sm:$0xff]  ;;  %v1317_v20 = vpack.c.bf16 %v341_v14, %v339_v13 }
  0x1f   :  { %v1315_v12 = vpack.c.bf16 %v342_v8, %v340_v7  ;;  %v346_v16 = vld [vmem:[%s2602_s0 + $0x1f8] sm:$0xff]  ;;  %v345_v24 = vld [vmem:[%s2602_s0 + $0x1f0] sm:$0xff]  ;;  %v14_v30 = vld [vmem:[%s2604_s2] sm:$0xff] }
  0x20   :  { %1217 = vmatmul.mubr.msk.f32.vlgmr.msra.gmra.mrb[0].mxu0 %vm367_vm0, %v159_v39  ;;  %v1319_v21 = vpack.c.bf16 %v346_v16, %v344_v15  ;;  %v37_v27 = vld [vmem:[%s2604_s2 + $0xb8] sm:$0xff]  ;;  %v18_v31 = vld [vmem:[%s2604_s2 + $0x20] sm:$0xff]  ;;  %v43_v39 = vld [vmem:[%s2604_s2 + $0xe8] sm:$0xff] }
  0x21   :  { %1290 = vmatpush1.bf16.msra.mxu1 %v1289_v18  ;;  %881 = vmatprep.mubr.f32.mxu0 %v1428_v3  ;;  %v144_v18 = vsub.s32 0, %v1570_v60  ;;  %v177_v60 = vmul.f32 %v1640_v29, %v34_v19  ;;  %v17_v35 = vld [vmem:[%s2604_s2 + $0x18] sm:$0xff]  ;;  %v186_v43 = vmul.f32 %v1640_v29, %v43_v39  ;;  %v46_v45 = vld [vmem:[%s2604_s2 + $0x100] sm:$0xff]  ;;  %v27_v48 = vld [vmem:[%s2604_s2 + $0x68] sm:$0xff] }
  0x22   :  { %1292 = vmatprep.subr.bf16.mxu1 %v1291_v23  ;;  %v343_v23 = vld [vmem:[%s2602_s0 + $0x1e0] sm:$0xff]  ;;  %v21_v36 = vld [vmem:[%s2604_s2 + $0x38] sm:$0xff]  ;;  %v170_v52 = vmul.f32 %v1631_v26, %v27_v48  ;;  %v39_v10 = vld [vmem:[%s2604_s2 + $0xc8] sm:$0xff] }
  0x23   :  { %v1762_v25 = vrot.slane %v1622_v22, %v144_v18  ;;  %v1321_v28 = vpack.c.bf16 %v345_v24, %v343_v23  ;;  %v180_v22 = vmul.f32 %v1640_v29, %v37_v27  ;;  %v164_v40 = vmul.f32 %v1631_v26, %v21_v36  ;;  %v49_v51 = vld [vmem:[%s2604_s2 + $0x118] sm:$0xff]  ;;  %v26_v53 = vld [vmem:[%s2604_s2 + $0x60] sm:$0xff]  ;;  %v64_v19 = vld [vmem:[%s2604_s2 + $0x190] sm:$0xff] }
  0x24   :  { %1218 = vmatmul.mubr.msk.f32.gmra.mrb[2].mxu0 %vm367_vm0, %v162_v47  ;;  %v23_v47 = vld [vmem:[%s2604_s2 + $0x48] sm:$0xff]  ;;  %v30_v54 = vld [vmem:[%s2604_s2 + $0x80] sm:$0xff]  ;;  %v29_v59 = vld [vmem:[%s2604_s2 + $0x78] sm:$0xff]  ;;  %v182_v14 = vmul.f32 %v1631_v26, %v39_v10  ;;  %v207_v24 = vmul.f32 %v1640_v29, %v64_v19 }
  0x25   :  { %1294 = vmatpush1.bf16.msra.mxu1 %v1293_v33  ;;  %887 = vmatprep.mubr.f32.mxu0 %v1428_v3  ;;  %v157_v32 = vmul.f32 %v1762_v25, %v14_v30  ;;  %v40_v33 = vld [vmem:[%s2604_s2 + $0xd0] sm:$0xff]  ;;  %v160_v38 = vmul.f32 %v1762_v25, %v17_v35  ;;  %v169_v56 = vmul.f32 %v1762_v25, %v26_v53  ;;  %v33_v61 = vld [vmem:[%s2604_s2 + $0x98] sm:$0xff]  ;;  %v58_v7 = vld [vmem:[%s2604_s2 + $0x160] sm:$0xff] }
  0x26   :  { %1296 = vmatprep.subr.bf16.mxu1 %v1295_v34  ;;  %v161_v34 = vmul.f32 %v1631_v26, %v18_v31  ;;  %v183_v37 = vmul.f32 %v1640_v29, %v40_v33  ;;  %v172_v63 = vmul.f32 %v1762_v25, %v29_v59  ;;  %v176_v1 = vmul.f32 %v1631_v26, %v33_v61  ;;  %v61_v13 = vld [vmem:[%s2604_s2 + $0x178] sm:$0xff]  ;;  %v38_v15 = vld [vmem:[%s2604_s2 + $0xc0] sm:$0xff]  ;;  %v67_v27 = vld [vmem:[%s2604_s2 + $0x1a8] sm:$0xff] }
  0x27   :  { %v42_v16 = vld [vmem:[%s2604_s2 + $0xe0] sm:$0xff]  ;;  %v181_v18 = vmul.f32 %v1762_v25, %v38_v15  ;;  %v45_v23 = vld [vmem:[%s2604_s2 + $0xf8] sm:$0xff]  ;;  %v44_v30 = vld [vmem:[%s2604_s2 + $0xf0] sm:$0xff] }
  0x28   :  { %1219 = vmatmul.mubr.msk.f32.gmra.mrb[4].mxu0 %vm367_vm0, %v165_v55  ;;  %v192_v55 = vmul.f32 %v1640_v29, %v49_v51  ;;  %v48_v31 = vld [vmem:[%s2604_s2 + $0x110] sm:$0xff]  ;;  %v70_v33 = vld [vmem:[%s2604_s2 + $0x1c0] sm:$0xff]  ;;  %v47_v35 = vld [vmem:[%s2604_s2 + $0x108] sm:$0xff] }
  0x29   :  { %1298 = vmatpush1.bf16.msra.mxu1 %v1297_v41  ;;  %893 = vmatprep.mubr.f32.mxu0 %v1428_v3  ;;  %v20_v41 = vld [vmem:[%s2604_s2 + $0x30] sm:$0xff]  ;;  %v51_v36 = vld [vmem:[%s2604_s2 + $0x128] sm:$0xff]  ;;  %v73_v39 = vld [vmem:[%s2604_s2 + $0x1d8] sm:$0xff] }
  0x2a   :  { %1300 = vmatprep.subr.bf16.mxu1 %v1299_v42  ;;  %v24_v42 = vld [vmem:[%s2604_s2 + $0x50] sm:$0xff]  ;;  %v163_v44 = vmul.f32 %v1762_v25, %v20_v41  ;;  %v50_v41 = vld [vmem:[%s2604_s2 + $0x120] sm:$0xff]  ;;  %v57_v48 = vld [vmem:[%s2604_s2 + $0x158] sm:$0xff] }
  0x2b   :  { %v167_v46 = vmul.f32 %v1631_v26, %v24_v42  ;;  %v54_v42 = vld [vmem:[%s2604_s2 + $0x140] sm:$0xff]  ;;  %v79_v51 = vld [vmem:[%s2604_s2 + $0x208] sm:$0xff]  ;;  %v56_v53 = vld [vmem:[%s2604_s2 + $0x150] sm:$0xff] }
  0x2c   :  { %1220 = vmatmul.mubr.msk.f32.gmra.mrb[6].mxu0 %vm367_vm0, %v168_v0  ;;  %v55_v0 = vld [vmem:[%s2604_s2 + $0x148] sm:$0xff]  ;;  %v69_v10 = vld [vmem:[%s2604_s2 + $0x1b8] sm:$0xff]  ;;  %v68_v15 = vld [vmem:[%s2604_s2 + $0x1b0] sm:$0xff] }
  0x2d   :  { %1302 = vmatpush1.bf16.msra.mxu1 %v1301_v49  ;;  %899 = vmatprep.mubr.f32.mxu0 %v1428_v3  ;;  %v189_v49 = vmul.f32 %v1640_v29, %v46_v45  ;;  %v198_v5 = vmul.f32 %v1640_v29, %v55_v0  ;;  %v76_v45 = vld [vmem:[%s2604_s2 + $0x1f0] sm:$0xff]  ;;  %v59_v59 = vld [vmem:[%s2604_s2 + $0x168] sm:$0xff]  ;;  %v85_v0 = vld [vmem:[%s2604_s2 + $0x238] sm:$0xff] }
  0x2e   :  { %1304 = vmatprep.subr.bf16.mxu1 %v1303_v50  ;;  %v166_v50 = vmul.f32 %v1762_v25, %v23_v47  ;;  %v53_v47 = vld [vmem:[%s2604_s2 + $0x138] sm:$0xff]  ;;  %v63_v61 = vld [vmem:[%s2604_s2 + $0x188] sm:$0xff]  ;;  %v94_v19 = vld [vmem:[%s2604_s2 + $0x280] sm:$0xff] }
  0x30   :  { %1221 = vmatmul.mubr.msk.f32.gmra.mrb[8].mxu0 %vm367_vm0, %v171_v9  ;;  %v35_v9 = vld [vmem:[%s2604_s2 + $0xa8] sm:$0xff] }
  0x31   :  { %1306 = vmatpush1.bf16.msra.mxu1 %v1305_v57  ;;  %905 = vmatprep.mubr.f32.mxu0 %v1428_v3  ;;  %v52_v57 = vld [vmem:[%s2604_s2 + $0x130] sm:$0xff] }
  0x32   :  { %1308 = vmatprep.subr.bf16.mxu1 %v1307_v58  ;;  %v173_v58 = vmul.f32 %v1631_v26, %v30_v54  ;;  %v195_v62 = vmul.f32 %v1640_v29, %v52_v57  ;;  %v60_v54 = vld [vmem:[%s2604_s2 + $0x170] sm:$0xff]  ;;  %v82_v57 = vld [vmem:[%s2604_s2 + $0x220] sm:$0xff] }
  0x34   :  { %1222 = vmatmul.mubr.msk.f32.gmra.mrb[10].mxu0 %vm367_vm0, %v174_v17  ;;  %v204_v17 = vmul.f32 %v1640_v29, %v61_v13  ;;  %v91_v13 = vld [vmem:[%s2604_s2 + $0x268] sm:$0xff] }
  0x35   :  { %1310 = vmatpush1.bf16.msra.mxu1 %v1309_v2  ;;  %911 = vmatprep.mubr.f32.mxu0 %v1428_v3  ;;  %v32_v2 = vld [vmem:[%s2604_s2 + $0x90] sm:$0xff] }
  0x36   :  { %1312 = vmatprep.subr.bf16.mxu1 %v1311_v4  ;;  %v36_v4 = vld [vmem:[%s2604_s2 + $0xb0] sm:$0xff]  ;;  %v175_v6 = vmul.f32 %v1762_v25, %v32_v2  ;;  %v62_v2 = vld [vmem:[%s2604_s2 + $0x180] sm:$0xff] }
  0x37   :  { %v179_v8 = vmul.f32 %v1631_v26, %v36_v4  ;;  %v66_v4 = vld [vmem:[%s2604_s2 + $0x1a0] sm:$0xff] }
  0x38   :  { %1223 = vmatmul.mubr.msk.f32.gmra.mrb[12].mxu0 %vm367_vm0, %v177_v60 }
  0x39   :  { %1314 = vmatpush1.bf16.msra.mxu1 %v1313_v11  ;;  %917 = vmatprep.mubr.f32.mxu0 %v1428_v3  ;;  %v201_v11 = vmul.f32 %v1640_v29, %v58_v7  ;;  %v88_v7 = vld [vmem:[%s2604_s2 + $0x250] sm:$0xff] }
  0x3a   :  { %1316 = vmatprep.subr.bf16.mxu1 %v1315_v12  ;;  %v178_v12 = vmul.f32 %v1762_v25, %v35_v9  ;;  %v65_v9 = vld [vmem:[%s2604_s2 + $0x198] sm:$0xff] }
  0x3c   :  { %1224 = vmatmul.mubr.msk.f32.gmra.mrb[14].mxu0 %vm367_vm0, %v180_v22  ;;  %v210_v22 = vmul.f32 %v1640_v29, %v67_v27  ;;  %v97_v27 = vld [vmem:[%s2604_s2 + $0x298] sm:$0xff] }
  0x3d   :  { %1318 = vmatpush1.bf16.msra.mxu1 %v1317_v20  ;;  %923 = vmatprep.mubr.f32.mxu0 %v1428_v3  ;;  %v185_v20 = vmul.f32 %v1631_v26, %v42_v16  ;;  %v72_v16 = vld [vmem:[%s2604_s2 + $0x1d0] sm:$0xff] }
  0x3e   :  { %1320 = vmatprep.subr.bf16.mxu1 %v1319_v21  ;;  %v41_v21 = vld [vmem:[%s2604_s2 + $0xd8] sm:$0xff] }
  0x3f   :  { %v184_v60 = vmul.f32 %v1762_v25, %v41_v21  ;;  %v71_v21 = vld [vmem:[%s2604_s2 + $0x1c8] sm:$0xff] }
  0x40   :  { %1225 = vmatmul.mubr.msk.f32.gmra.mrb[16].mxu0 %vm367_vm0, %v183_v37  ;;  %v213_v37 = vmul.f32 %v1640_v29, %v70_v33  ;;  %v100_v33 = vld [vmem:[%s2604_s2 + $0x2b0] sm:$0xff] }
  0x41   :  { %1322 = vmatpush1.bf16.msra.mxu1 %v1321_v28  ;;  %929 = vmatprep.mubr.f32.mxu0 %v1428_v3  ;;  %v188_v28 = vmul.f32 %v1631_v26, %v45_v23  ;;  %v75_v23 = vld [vmem:[%s2604_s2 + $0x1e8] sm:$0xff] }
  0x44   :  { %559 = vmatmul.mubr.f32.vlgmr.msra.gmra.mrb[0].mxu1 %v157_v32  ;;  %1226 = vmatmul.mubr.msk.f32.gmra.mrb[18].mxu0 %vm367_vm0, %v186_v43  ;;  %v187_v32 = vmul.f32 %v1762_v25, %v44_v30  ;;  %v216_v43 = vmul.f32 %v1640_v29, %v73_v39  ;;  %v74_v30 = vld [vmem:[%s2604_s2 + $0x1e0] sm:$0xff]  ;;  %v103_v39 = vld [vmem:[%s2604_s2 + $0x2c8] sm:$0xff] }
  0x45   :  { %564 = vmatprep.mubr.f32.mxu1 %v161_v34  ;;  %935 = vmatprep.mubr.f32.mxu0 %v1428_v3  ;;  %v191_v34 = vmul.f32 %v1631_v26, %v48_v31  ;;  %v78_v31 = vld [vmem:[%s2604_s2 + $0x200] sm:$0xff] }
  0x48   :  { %565 = vmatmul.mubr.f32.gmra.mrb[2].mxu1 %v160_v38  ;;  %1227 = vmatmul.mubr.msk.f32.gmra.mrb[20].mxu0 %vm367_vm0, %v189_v49  ;;  %v190_v38 = vmul.f32 %v1762_v25, %v47_v35  ;;  %v219_v49 = vmul.f32 %v1640_v29, %v76_v45  ;;  %v77_v35 = vld [vmem:[%s2604_s2 + $0x1f8] sm:$0xff]  ;;  %v106_v45 = vld [vmem:[%s2604_s2 + $0x2e0] sm:$0xff] }
  0x49   :  { %570 = vmatprep.mubr.f32.mxu1 %v164_v40  ;;  %941 = vmatprep.mubr.f32.mxu0 %v1428_v3  ;;  %v194_v40 = vmul.f32 %v1631_v26, %v51_v36  ;;  %v81_v36 = vld [vmem:[%s2604_s2 + $0x218] sm:$0xff] }
  0x4c   :  { %571 = vmatmul.mubr.f32.gmra.mrb[4].mxu1 %v163_v44  ;;  %1228 = vmatmul.mubr.msk.f32.gmra.mrb[22].mxu0 %vm367_vm0, %v192_v55  ;;  %v193_v44 = vmul.f32 %v1762_v25, %v50_v41  ;;  %v222_v55 = vmul.f32 %v1640_v29, %v79_v51  ;;  %v80_v41 = vld [vmem:[%s2604_s2 + $0x210] sm:$0xff]  ;;  %v109_v51 = vld [vmem:[%s2604_s2 + $0x2f8] sm:$0xff] }
  0x4d   :  { %576 = vmatprep.mubr.f32.mxu1 %v167_v46  ;;  %947 = vmatprep.mubr.f32.mxu0 %v1428_v3  ;;  %v197_v46 = vmul.f32 %v1631_v26, %v54_v42  ;;  %v84_v42 = vld [vmem:[%s2604_s2 + $0x230] sm:$0xff] }
  0x50   :  { %577 = vmatmul.mubr.f32.gmra.mrb[6].mxu1 %v166_v50  ;;  %1229 = vmatmul.mubr.msk.f32.gmra.mrb[24].mxu0 %vm367_vm0, %v195_v62  ;;  %v196_v50 = vmul.f32 %v1762_v25, %v53_v47  ;;  %v225_v62 = vmul.f32 %v1640_v29, %v82_v57  ;;  %v83_v47 = vld [vmem:[%s2604_s2 + $0x228] sm:$0xff]  ;;  %v112_v57 = vld [vmem:[%s2604_s2 + $0x310] sm:$0xff] }
  0x51   :  { %582 = vmatprep.mubr.f32.mxu1 %v170_v52  ;;  %953 = vmatprep.mubr.f32.mxu0 %v1428_v3  ;;  %v200_v52 = vmul.f32 %v1631_v26, %v57_v48  ;;  %v87_v48 = vld [vmem:[%s2604_s2 + $0x248] sm:$0xff] }
  0x54   :  { %583 = vmatmul.mubr.f32.gmra.mrb[8].mxu1 %v169_v56  ;;  %1230 = vmatmul.mubr.msk.f32.gmra.mrb[26].mxu0 %vm367_vm0, %v198_v5  ;;  %v199_v56 = vmul.f32 %v1762_v25, %v56_v53  ;;  %v228_v5 = vmul.f32 %v1640_v29, %v85_v0  ;;  %v86_v53 = vld [vmem:[%s2604_s2 + $0x240] sm:$0xff]  ;;  %v115_v0 = vld [vmem:[%s2604_s2 + $0x328] sm:$0xff] }
  0x55   :  { %588 = vmatprep.mubr.f32.mxu1 %v173_v58  ;;  %959 = vmatprep.mubr.f32.mxu0 %v1428_v3  ;;  %v203_v58 = vmul.f32 %v1631_v26, %v60_v54  ;;  %v90_v54 = vld [vmem:[%s2604_s2 + $0x260] sm:$0xff] }
  0x58   :  { %589 = vmatmul.mubr.f32.gmra.mrb[10].mxu1 %v172_v63  ;;  %1231 = vmatmul.mubr.msk.f32.gmra.mrb[28].mxu0 %vm367_vm0, %v201_v11  ;;  %v202_v63 = vmul.f32 %v1762_v25, %v59_v59  ;;  %v231_v11 = vmul.f32 %v1640_v29, %v88_v7  ;;  %v89_v59 = vld [vmem:[%s2604_s2 + $0x258] sm:$0xff]  ;;  %v118_v7 = vld [vmem:[%s2604_s2 + $0x340] sm:$0xff] }
  0x59   :  { %594 = vmatprep.mubr.f32.mxu1 %v176_v1  ;;  %965 = vmatprep.mubr.f32.mxu0 %v1428_v3  ;;  %v206_v1 = vmul.f32 %v1631_v26, %v63_v61  ;;  %v93_v61 = vld [vmem:[%s2604_s2 + $0x278] sm:$0xff] }
  0x5c   :  { %595 = vmatmul.mubr.f32.gmra.mrb[12].mxu1 %v175_v6  ;;  %1232 = vmatmul.mubr.msk.f32.gmra.mrb[30].mxu0 %vm367_vm0, %v204_v17  ;;  %v205_v6 = vmul.f32 %v1762_v25, %v62_v2  ;;  %v234_v17 = vmul.f32 %v1640_v29, %v91_v13  ;;  %v92_v2 = vld [vmem:[%s2604_s2 + $0x270] sm:$0xff]  ;;  %v121_v13 = vld [vmem:[%s2604_s2 + $0x358] sm:$0xff] }
  0x5d   :  { %600 = vmatprep.mubr.f32.mxu1 %v179_v8  ;;  %971 = vmatprep.mubr.f32.mxu0 %v1428_v3  ;;  %v209_v8 = vmul.f32 %v1631_v26, %v66_v4  ;;  %v96_v4 = vld [vmem:[%s2604_s2 + $0x290] sm:$0xff] }
  0x60   :  { %601 = vmatmul.mubr.f32.gmra.mrb[14].mxu1 %v178_v12  ;;  %1233 = vmatmul.mubr.msk.f32.gmra.mrb[32].mxu0 %vm367_vm0, %v207_v24  ;;  %v208_v12 = vmul.f32 %v1762_v25, %v65_v9  ;;  %v237_v24 = vmul.f32 %v1640_v29, %v94_v19  ;;  %v95_v9 = vld [vmem:[%s2604_s2 + $0x288] sm:$0xff]  ;;  %v124_v19 = vld [vmem:[%s2604_s2 + $0x370] sm:$0xff] }
  0x61   :  { %606 = vmatprep.mubr.f32.mxu1 %v182_v14  ;;  %977 = vmatprep.mubr.f32.mxu0 %v1428_v3  ;;  %v212_v14 = vmul.f32 %v1631_v26, %v69_v10  ;;  %v99_v10 = vld [vmem:[%s2604_s2 + $0x2a8] sm:$0xff] }
  0x64   :  { %607 = vmatmul.mubr.f32.gmra.mrb[16].mxu1 %v181_v18  ;;  %1234 = vmatmul.mubr.msk.f32.gmra.mrb[34].mxu0 %vm367_vm0, %v210_v22  ;;  %v211_v18 = vmul.f32 %v1762_v25, %v68_v15  ;;  %v240_v22 = vmul.f32 %v1640_v29, %v97_v27  ;;  %v98_v15 = vld [vmem:[%s2604_s2 + $0x2a0] sm:$0xff]  ;;  %v127_v27 = vld [vmem:[%s2604_s2 + $0x388] sm:$0xff] }
  0x65   :  { %612 = vmatprep.mubr.f32.mxu1 %v185_v20  ;;  %983 = vmatprep.mubr.f32.mxu0 %v1428_v3  ;;  %v215_v20 = vmul.f32 %v1631_v26, %v72_v16  ;;  %v102_v16 = vld [vmem:[%s2604_s2 + $0x2c0] sm:$0xff] }
  0x68   :  { %613 = vmatmul.mubr.f32.gmra.mrb[18].mxu1 %v184_v60  ;;  %1235 = vmatmul.mubr.msk.f32.gmra.mrb[36].mxu0 %vm367_vm0, %v213_v37  ;;  %v214_v60 = vmul.f32 %v1762_v25, %v71_v21  ;;  %v243_v37 = vmul.f32 %v1640_v29, %v100_v33  ;;  %v101_v21 = vld [vmem:[%s2604_s2 + $0x2b8] sm:$0xff]  ;;  %v130_v33 = vld [vmem:[%s2604_s2 + $0x3a0] sm:$0xff] }
  0x69   :  { %618 = vmatprep.mubr.f32.mxu1 %v188_v28  ;;  %989 = vmatprep.mubr.f32.mxu0 %v1428_v3  ;;  %v218_v28 = vmul.f32 %v1631_v26, %v75_v23  ;;  %v105_v23 = vld [vmem:[%s2604_s2 + $0x2d8] sm:$0xff] }
  0x6c   :  { %619 = vmatmul.mubr.f32.gmra.mrb[20].mxu1 %v187_v32  ;;  %1236 = vmatmul.mubr.msk.f32.gmra.mrb[38].mxu0 %vm367_vm0, %v216_v43  ;;  %v217_v32 = vmul.f32 %v1762_v25, %v74_v30  ;;  %v246_v43 = vmul.f32 %v1640_v29, %v103_v39  ;;  %v104_v30 = vld [vmem:[%s2604_s2 + $0x2d0] sm:$0xff]  ;;  %v133_v39 = vld [vmem:[%s2604_s2 + $0x3b8] sm:$0xff] }
  0x6d   :  { %624 = vmatprep.mubr.f32.mxu1 %v191_v34  ;;  %995 = vmatprep.mubr.f32.mxu0 %v1428_v3  ;;  %v221_v34 = vmul.f32 %v1631_v26, %v78_v31  ;;  %v108_v31 = vld [vmem:[%s2604_s2 + $0x2f0] sm:$0xff] }
  0x70   :  { %625 = vmatmul.mubr.f32.gmra.mrb[22].mxu1 %v190_v38  ;;  %1237 = vmatmul.mubr.msk.f32.gmra.mrb[40].mxu0 %vm367_vm0, %v219_v49  ;;  %v220_v38 = vmul.f32 %v1762_v25, %v77_v35  ;;  %v249_v49 = vmul.f32 %v1640_v29, %v106_v45  ;;  %v107_v35 = vld [vmem:[%s2604_s2 + $0x2e8] sm:$0xff]  ;;  %v136_v45 = vld [vmem:[%s2604_s2 + $0x3d0] sm:$0xff] }
  0x71   :  { %630 = vmatprep.mubr.f32.mxu1 %v194_v40  ;;  %1001 = vmatprep.mubr.f32.mxu0 %v1428_v3  ;;  %v224_v40 = vmul.f32 %v1631_v26, %v81_v36  ;;  %v111_v36 = vld [vmem:[%s2604_s2 + $0x308] sm:$0xff] }
  0x74   :  { %631 = vmatmul.mubr.f32.gmra.mrb[24].mxu1 %v193_v44  ;;  %1238 = vmatmul.mubr.msk.f32.gmra.mrb[42].mxu0 %vm367_vm0, %v222_v55  ;;  %v223_v44 = vmul.f32 %v1762_v25, %v80_v41  ;;  %v252_v55 = vmul.f32 %v1640_v29, %v109_v51  ;;  %v110_v41 = vld [vmem:[%s2604_s2 + $0x300] sm:$0xff]  ;;  %v139_v51 = vld [vmem:[%s2604_s2 + $0x3e8] sm:$0xff] }
  0x75   :  { %636 = vmatprep.mubr.f32.mxu1 %v197_v46  ;;  %1007 = vmatprep.mubr.f32.mxu0 %v1428_v3  ;;  %v227_v46 = vmul.f32 %v1631_v26, %v84_v42  ;;  %v114_v42 = vld [vmem:[%s2604_s2 + $0x320] sm:$0xff] }
  0x78   :  { %637 = vmatmul.mubr.f32.gmra.mrb[26].mxu1 %v196_v50  ;;  %1239 = vmatmul.mubr.msk.f32.gmra.mrb[44].mxu0 %vm367_vm0, %v225_v62  ;;  %v226_v50 = vmul.f32 %v1762_v25, %v83_v47  ;;  %v255_v62 = vmul.f32 %v1640_v29, %v112_v57  ;;  %v113_v47 = vld [vmem:[%s2604_s2 + $0x318] sm:$0xff] }
  0x79   :  { %642 = vmatprep.mubr.f32.mxu1 %v200_v52  ;;  %1013 = vmatprep.mubr.f32.mxu0 %v1428_v3  ;;  %v230_v52 = vmul.f32 %v1631_v26, %v87_v48  ;;  %v117_v48 = vld [vmem:[%s2604_s2 + $0x338] sm:$0xff] }
  0x7c   :  { %643 = vmatmul.mubr.f32.gmra.mrb[28].mxu1 %v199_v56  ;;  %1240 = vmatmul.mubr.msk.f32.gmra.mrb[46].mxu0 %vm367_vm0, %v228_v5  ;;  %v229_v56 = vmul.f32 %v1762_v25, %v86_v53  ;;  %v258_v5 = vmul.f32 %v1640_v29, %v115_v0  ;;  %v116_v53 = vld [vmem:[%s2604_s2 + $0x330] sm:$0xff] }
  0x7d   :  { %648 = vmatprep.mubr.f32.mxu1 %v203_v58  ;;  %1019 = vmatprep.mubr.f32.mxu0 %v1428_v3  ;;  %v233_v58 = vmul.f32 %v1631_v26, %v90_v54  ;;  %v120_v54 = vld [vmem:[%s2604_s2 + $0x350] sm:$0xff] }
  0x7e   :  { %v263_v57 = vmul.f32 %v1631_v26, %v120_v54 }
  0x80   :  { %649 = vmatmul.mubr.f32.gmra.mrb[30].mxu1 %v202_v63  ;;  %1241 = vmatmul.mubr.msk.f32.gmra.mrb[48].mxu0 %vm367_vm0, %v231_v11  ;;  %v232_v63 = vmul.f32 %v1762_v25, %v89_v59  ;;  %v261_v11 = vmul.f32 %v1640_v29, %v118_v7  ;;  %v123_v59 = vld [vmem:[%s2604_s2 + $0x368] sm:$0xff]  ;;  %v132_v7 = vld [vmem:[%s2604_s2 + $0x3b0] sm:$0xff] }
  0x81   :  { %654 = vmatprep.mubr.f32.mxu1 %v206_v1  ;;  %1025 = vmatprep.mubr.f32.mxu0 %v1428_v3  ;;  %v236_v1 = vmul.f32 %v1631_v26, %v93_v61  ;;  %v266_v61 = vmul.f32 %v1631_v26, %v123_v59 }
  0x84   :  { %655 = vmatmul.mubr.f32.gmra.mrb[32].mxu1 %v205_v6  ;;  %1242 = vmatmul.mubr.msk.f32.gmra.mrb[50].mxu0 %vm367_vm0, %v234_v17  ;;  %v235_v6 = vmul.f32 %v1762_v25, %v92_v2  ;;  %v264_v17 = vmul.f32 %v1640_v29, %v121_v13  ;;  %v129_v2 = vld [vmem:[%s2604_s2 + $0x398] sm:$0xff] }
  0x85   :  { %660 = vmatprep.mubr.f32.mxu1 %v209_v8  ;;  %1031 = vmatprep.mubr.f32.mxu0 %v1428_v3  ;;  %v239_v8 = vmul.f32 %v1631_v26, %v96_v4 }
  0x88   :  { %661 = vmatmul.mubr.f32.gmra.mrb[34].mxu1 %v208_v12  ;;  %1243 = vmatmul.mubr.msk.f32.gmra.mrb[52].mxu0 %vm367_vm0, %v237_v24  ;;  %v238_v12 = vmul.f32 %v1762_v25, %v95_v9  ;;  %v267_v24 = vmul.f32 %v1640_v29, %v124_v19  ;;  %v275_v9 = vmul.f32 %v1631_v26, %v132_v7 }
  0x89   :  { %666 = vmatprep.mubr.f32.mxu1 %v212_v14  ;;  %1037 = vmatprep.mubr.f32.mxu0 %v1428_v3  ;;  %v242_v14 = vmul.f32 %v1631_v26, %v99_v10  ;;  %v131_v10 = vld [vmem:[%s2604_s2 + $0x3a8] sm:$0xff] }
  0x8c   :  { %667 = vmatmul.mubr.f32.gmra.mrb[36].mxu1 %v211_v18  ;;  %1244 = vmatmul.mubr.msk.f32.gmra.mrb[54].mxu0 %vm367_vm0, %v240_v22  ;;  %v241_v18 = vmul.f32 %v1762_v25, %v98_v15  ;;  %v270_v22 = vmul.f32 %v1640_v29, %v127_v27  ;;  %v138_v15 = vld [vmem:[%s2604_s2 + $0x3e0] sm:$0xff] }
  0x8d   :  { %672 = vmatprep.mubr.f32.mxu1 %v215_v20  ;;  %1043 = vmatprep.mubr.f32.mxu0 %v1428_v3  ;;  %v245_v20 = vmul.f32 %v1631_v26, %v102_v16 }
  0x90   :  { %673 = vmatmul.mubr.f32.gmra.mrb[38].mxu1 %v214_v60  ;;  %1245 = vmatmul.mubr.msk.f32.gmra.mrb[56].mxu0 %vm367_vm0, %v243_v37  ;;  %v244_v60 = vmul.f32 %v1762_v25, %v101_v21  ;;  %v273_v37 = vmul.f32 %v1640_v29, %v130_v33 }
  0x91   :  { %678 = vmatprep.mubr.f32.mxu1 %v218_v28  ;;  %1049 = vmatprep.mubr.f32.mxu0 %v1428_v3  ;;  %v248_v28 = vmul.f32 %v1631_v26, %v105_v23 }
  0x94   :  { %679 = vmatmul.mubr.f32.gmra.mrb[40].mxu1 %v217_v32  ;;  %1246 = vmatmul.mubr.msk.f32.gmra.mrb[58].mxu0 %vm367_vm0, %v246_v43  ;;  %v247_v32 = vmul.f32 %v1762_v25, %v104_v30  ;;  %v276_v43 = vmul.f32 %v1640_v29, %v133_v39 }
  0x95   :  { %684 = vmatprep.mubr.f32.mxu1 %v221_v34  ;;  %1055 = vmatprep.mubr.f32.mxu0 %v1428_v3  ;;  %v251_v34 = vmul.f32 %v1631_v26, %v108_v31 }
  0x98   :  { %685 = vmatmul.mubr.f32.gmra.mrb[42].mxu1 %v220_v38  ;;  %1247 = vmatmul.mubr.msk.f32.gmra.mrb[60].mxu0 %vm367_vm0, %v249_v49  ;;  %v250_v38 = vmul.f32 %v1762_v25, %v107_v35  ;;  %v279_v49 = vmul.f32 %v1640_v29, %v136_v45 }
  0x99   :  { %690 = vmatprep.mubr.f32.mxu1 %v224_v40  ;;  %1061 = vmatprep.mubr.f32.mxu0 %v1428_v3  ;;  %v254_v40 = vmul.f32 %v1631_v26, %v111_v36 }
  0x9c   :  { %691 = vmatmul.mubr.f32.gmra.mrb[44].mxu1 %v223_v44  ;;  %1248 = vmatmul.mubr.msk.f32.gmra.mrb[62].mxu0 %vm367_vm0, %v252_v55  ;;  %v253_v44 = vmul.f32 %v1762_v25, %v110_v41  ;;  %v282_v55 = vmul.f32 %v1640_v29, %v139_v51 }
  0x9d   :  { %696 = vmatprep.mubr.f32.mxu1 %v227_v46  ;;  %1067 = vmatprep.mubr.f32.mxu0 %v1428_v3  ;;  %v257_v46 = vmul.f32 %v1631_v26, %v114_v42 }
  0xa0   :  { %697 = vmatmul.mubr.f32.gmra.mrb[46].mxu1 %v226_v50  ;;  %1249 = vmatmul.mubr.msk.f32.gmra.mrb[64].mxu0 %vm367_vm0, %v255_v62  ;;  %v256_v50 = vmul.f32 %v1762_v25, %v113_v47  ;;  %v126_v62 = vld [vmem:[%s2604_s2 + $0x380] sm:$0xff] }
  0xa1   :  { %702 = vmatprep.mubr.f32.mxu1 %v230_v52  ;;  %1073 = vmatprep.mubr.f32.mxu0 %v1428_v3  ;;  %v260_v52 = vmul.f32 %v1631_v26, %v117_v48  ;;  %v269_v0 = vmul.f32 %v1631_v26, %v126_v62 }
  0xa4   :  { %703 = vmatmul.mubr.f32.gmra.mrb[48].mxu1 %v229_v56  ;;  %1250 = vmatmul.mubr.msk.f32.gmra.mrb[66].mxu0 %vm367_vm0, %v258_v5  ;;  %v259_v56 = vmul.f32 %v1762_v25, %v116_v53  ;;  %v272_v5 = vmul.f32 %v1631_v26, %v129_v2 }
  0xa5   :  { %708 = vmatprep.mubr.f32.mxu1 %v233_v58  ;;  %1079 = vmatprep.mubr.f32.mxu0 %v1428_v3  ;;  %v119_v58 = vld [vmem:[%s2604_s2 + $0x348] sm:$0xff] }
  0xa6   :  { %v262_v29 = vmul.f32 %v1762_v25, %v119_v58 }
  0xa8   :  { %709 = vmatmul.mubr.f32.gmra.mrb[50].mxu1 %v232_v63  ;;  %1251 = vmatmul.mubr.msk.f32.gmra.mrb[68].mxu0 %vm367_vm0, %v261_v11  ;;  %v135_v11 = vld [vmem:[%s2604_s2 + $0x3c8] sm:$0xff] }
  0xa9   :  { %714 = vmatprep.mubr.f32.mxu1 %v236_v1  ;;  %1085 = vmatprep.mubr.f32.mxu0 %v1428_v3  ;;  %v125_v1 = vld [vmem:[%s2604_s2 + $0x378] sm:$0xff]  ;;  %v278_v13 = vmul.f32 %v1631_v26, %v135_v11 }
  0xaa   :  { %v268_v4 = vmul.f32 %v1762_v25, %v125_v1 }
  0xac   :  { %715 = vmatmul.mubr.f32.gmra.mrb[52].mxu1 %v235_v6  ;;  %1252 = vmatmul.mubr.msk.f32.gmra.mrb[70].mxu0 %vm367_vm0, %v264_v17  ;;  %v128_v6 = vld [vmem:[%s2604_s2 + $0x390] sm:$0xff]  ;;  %v281_v17 = vmul.f32 %v1631_v26, %v138_v15 }
  0xad   :  { %720 = vmatprep.mubr.f32.mxu1 %v239_v8  ;;  %1091 = vmatprep.mubr.f32.mxu0 %v1428_v3  ;;  %v271_v8 = vmul.f32 %v1762_v25, %v128_v6 }
  0xb0   :  { %721 = vmatmul.mubr.f32.gmra.mrb[54].mxu1 %v238_v12  ;;  %1253 = vmatmul.mubr.msk.f32.gmra.mrb[72].mxu0 %vm367_vm0, %v267_v24  ;;  %v274_v12 = vmul.f32 %v1762_v25, %v131_v10 }
  0xb1   :  { %726 = vmatprep.mubr.f32.mxu1 %v242_v14  ;;  %1097 = vmatprep.mubr.f32.mxu0 %v1428_v3  ;;  %v134_v14 = vld [vmem:[%s2604_s2 + $0x3c0] sm:$0xff] }
  0xb2   :  { %v277_v16 = vmul.f32 %v1762_v25, %v134_v14 }
  0xb4   :  { %727 = vmatmul.mubr.f32.gmra.mrb[56].mxu1 %v241_v18  ;;  %1254 = vmatmul.mubr.msk.f32.gmra.mrb[74].mxu0 %vm367_vm0, %v270_v22  ;;  %v137_v18 = vld [vmem:[%s2604_s2 + $0x3d8] sm:$0xff] }
  0xb5   :  { %732 = vmatprep.mubr.f32.mxu1 %v245_v20  ;;  %1103 = vmatprep.mubr.f32.mxu0 %v1428_v3  ;;  %v280_v19 = vmul.f32 %v1762_v25, %v137_v18 }
  0xb8   :  { %733 = vmatmul.mubr.f32.gmra.mrb[58].mxu1 %v244_v60  ;;  %1255 = vmatmul.mubr.msk.f32.gmra.mrb[76].mxu0 %vm367_vm0, %v273_v37 }
  0xb9   :  { %738 = vmatprep.mubr.f32.mxu1 %v248_v28  ;;  %1109 = vmatprep.mubr.f32.mxu0 %v1428_v3 }
  0xbc   :  { %739 = vmatmul.mubr.f32.gmra.mrb[60].mxu1 %v247_v32  ;;  %1256 = vmatmul.mubr.msk.f32.gmra.mrb[78].mxu0 %vm367_vm0, %v276_v43 }
  0xbd   :  { %744 = vmatprep.mubr.f32.mxu1 %v251_v34  ;;  %1115 = vmatprep.mubr.f32.mxu0 %v1428_v3 }
  0xc0   :  { %745 = vmatmul.mubr.f32.gmra.mrb[62].mxu1 %v250_v38  ;;  %1257 = vmatmul.mubr.msk.f32.gmra.mrb[80].mxu0 %vm367_vm0, %v279_v49 }
  0xc1   :  { %750 = vmatprep.mubr.f32.mxu1 %v254_v40  ;;  %1121 = vmatprep.mubr.f32.mxu0 %v1428_v3  ;;  %v122_v3 = vld [vmem:[%s2604_s2 + $0x360] sm:$0xff] }
  0xc2   :  { %v265_v63 = vmul.f32 %v1762_v25, %v122_v3 }
  0xc4   :  { %751 = vmatmul.mubr.f32.gmra.mrb[64].mxu1 %v253_v44  ;;  %1258 = vmatmul.mubr.msk.f32.gmra.mrb[82].mxu0 %vm367_vm0, %v282_v55 }
  0xc5   :  { %756 = vmatprep.mubr.f32.mxu1 %v257_v46 }
  0xc8   :  { %757 = vmatmul.mubr.f32.gmra.mrb[66].mxu1 %v256_v50 }
  0xc9   :  { %762 = vmatprep.mubr.f32.mxu1 %v260_v52 }
  0xcc   :  { %763 = vmatmul.mubr.f32.gmra.mrb[68].mxu1 %v259_v56 }
  0xcd   :  { %768 = vmatprep.mubr.f32.mxu1 %v263_v57 }
  0xd0   :  { %769 = vmatmul.mubr.f32.gmra.mrb[70].mxu1 %v262_v29 }
  0xd1   :  { %774 = vmatprep.mubr.f32.mxu1 %v266_v61 }
  0xd4   :  { %775 = vmatmul.mubr.f32.gmra.mrb[72].mxu1 %v265_v63 }
  0xd5   :  { %780 = vmatprep.mubr.f32.mxu1 %v269_v0 }
  0xd8   :  { %781 = vmatmul.mubr.f32.gmra.mrb[74].mxu1 %v268_v4 }
  0xd9   :  { %786 = vmatprep.mubr.f32.mxu1 %v272_v5 }
  0xdc   :  { %787 = vmatmul.mubr.f32.gmra.mrb[76].mxu1 %v271_v8 }
  0xdd   :  { %792 = vmatprep.mubr.f32.mxu1 %v275_v9 }
  0xe0   :  { %793 = vmatmul.mubr.f32.gmra.mrb[78].mxu1 %v274_v12 }
  0xe1   :  { %798 = vmatprep.mubr.f32.mxu1 %v278_v13 }
  0xe4   :  { %799 = vmatmul.mubr.f32.gmra.mrb[80].mxu1 %v277_v16 }
  0xe5   :  { %804 = vmatprep.mubr.f32.mxu1 %v281_v17 }
  0xe8   :  { %805 = vmatmul.mubr.f32.gmra.mrb[82].mxu1 %v280_v19 }
  0xf3   :  { %v877_v20 = vpop.f32.mrb[0].mxu0 }
  0xf4   :  { %v879_v21 = vpop.f32.mrb[1].mxu0 }
  0xf7   :  { %v883_v23 = vpop.f32.mrb[2].mxu0 }
  0xf8   :  { %v885_v24 = vpop.f32.mrb[3].mxu0 }
  0xfb   :  { %v889_v60 = vpop.f32.mrb[4].mxu0 }
  0xfc   :  { %v891_v27 = vpop.f32.mrb[5].mxu0 }
  0xff   :  { %v895_v28 = vpop.f32.mrb[6].mxu0 }
 0x100   :  { %v897_v30 = vpop.f32.mrb[7].mxu0 }
 0x103   :  { %v901_v31 = vpop.f32.mrb[8].mxu0 }
 0x104   :  { %v903_v22 = vpop.f32.mrb[9].mxu0 }
 0x107   :  { %v907_v26 = vpop.f32.mrb[10].mxu0 }
 0x108   :  { %v909_v32 = vpop.f32.mrb[11].mxu0 }
 0x10b   :  { %v913_v33 = vpop.f32.mrb[12].mxu0 }
 0x10c   :  { %v915_v34 = vpop.f32.mrb[13].mxu0 }
 0x10f   :  { %v919_v35 = vpop.f32.mrb[14].mxu0 }
 0x110   :  { %v921_v37 = vpop.f32.mrb[15].mxu0 }
 0x113   :  { %v925_v40 = vpop.f32.mrb[16].mxu0 }
 0x114   :  { %v927_v42 = vpop.f32.mrb[17].mxu0 }
 0x117   :  { %v560_v36 = vpop.f32.mrb[0].mxu1  ;;  %v931_v46 = vpop.f32.mrb[18].mxu0 }
 0x118   :  { %v878_v25 = vadd.f32 %v877_v20, %v560_v36  ;;  %v562_v38 = vpop.f32.mrb[1].mxu1  ;;  %v933_v48 = vpop.f32.mrb[19].mxu0 }
 0x119   :  { %v880_v39 = vadd.f32 %v879_v21, %v562_v38 }
 0x11a   :  { %1128 = vst [vmem:[%s2605_s3] sm:$0xff] %v878_v25 }
 0x11b   :  { %1130 = vst.msk [vmem:[%s2605_s3 + $0x8] sm:$0xff] %vm1129_vm1, %v880_v39  ;;  %v566_v41 = vpop.f32.mrb[2].mxu1  ;;  %v937_v52 = vpop.f32.mrb[20].mxu0 }
 0x11c   :  { %v884_v43 = vadd.f32 %v883_v23, %v566_v41  ;;  %v568_v44 = vpop.f32.mrb[3].mxu1  ;;  %v939_v54 = vpop.f32.mrb[21].mxu0 }
 0x11d   :  { %v886_v45 = vadd.f32 %v885_v24, %v568_v44 }
 0x11e   :  { %1131 = vst [vmem:[%s2605_s3 + $0x10] sm:$0xff] %v884_v43 }
 0x11f   :  { %1132 = vst.msk [vmem:[%s2605_s3 + $0x18] sm:$0xff] %vm1129_vm1, %v886_v45  ;;  %v572_v47 = vpop.f32.mrb[4].mxu1  ;;  %v943_v58 = vpop.f32.mrb[22].mxu0 }
 0x120   :  { %v890_v49 = vadd.f32 %v889_v60, %v572_v47  ;;  %v574_v50 = vpop.f32.mrb[5].mxu1  ;;  %v945_v29 = vpop.f32.mrb[23].mxu0 }
 0x121   :  { %v892_v51 = vadd.f32 %v891_v27, %v574_v50 }
 0x122   :  { %1133 = vst [vmem:[%s2605_s3 + $0x20] sm:$0xff] %v890_v49 }
 0x123   :  { %1134 = vst.msk [vmem:[%s2605_s3 + $0x28] sm:$0xff] %vm1129_vm1, %v892_v51  ;;  %v578_v53 = vpop.f32.mrb[6].mxu1  ;;  %v949_v63 = vpop.f32.mrb[24].mxu0 }
 0x124   :  { %v896_v55 = vadd.f32 %v895_v28, %v578_v53  ;;  %v580_v56 = vpop.f32.mrb[7].mxu1  ;;  %v951_v1 = vpop.f32.mrb[25].mxu0 }
 0x125   :  { %v898_v57 = vadd.f32 %v897_v30, %v580_v56 }
 0x126   :  { %1135 = vst [vmem:[%s2605_s3 + $0x30] sm:$0xff] %v896_v55 }
 0x127   :  { %1136 = vst.msk [vmem:[%s2605_s3 + $0x38] sm:$0xff] %vm1129_vm1, %v898_v57  ;;  %v584_v59 = vpop.f32.mrb[8].mxu1  ;;  %v955_v6 = vpop.f32.mrb[26].mxu0 }
 0x128   :  { %v902_v61 = vadd.f32 %v901_v31, %v584_v59  ;;  %v586_v3 = vpop.f32.mrb[9].mxu1  ;;  %v957_v8 = vpop.f32.mrb[27].mxu0 }
 0x129   :  { %v904_v62 = vadd.f32 %v903_v22, %v586_v3 }
 0x12a   :  { %1137 = vst [vmem:[%s2605_s3 + $0x40] sm:$0xff] %v902_v61 }
 0x12b   :  { %1138 = vst.msk [vmem:[%s2605_s3 + $0x48] sm:$0xff] %vm1129_vm1, %v904_v62  ;;  %v590_v0 = vpop.f32.mrb[10].mxu1  ;;  %v961_v12 = vpop.f32.mrb[28].mxu0 }
 0x12c   :  { %v908_v2 = vadd.f32 %v907_v26, %v590_v0  ;;  %v592_v4 = vpop.f32.mrb[11].mxu1  ;;  %v963_v14 = vpop.f32.mrb[29].mxu0 }
 0x12d   :  { %v910_v5 = vadd.f32 %v909_v32, %v592_v4 }
 0x12e   :  { %1139 = vst [vmem:[%s2605_s3 + $0x50] sm:$0xff] %v908_v2 }
 0x12f   :  { %1140 = vst.msk [vmem:[%s2605_s3 + $0x58] sm:$0xff] %vm1129_vm1, %v910_v5  ;;  %v596_v7 = vpop.f32.mrb[12].mxu1  ;;  %v967_v18 = vpop.f32.mrb[30].mxu0 }
 0x130   :  { %v914_v9 = vadd.f32 %v913_v33, %v596_v7  ;;  %v598_v10 = vpop.f32.mrb[13].mxu1  ;;  %v969_v20 = vpop.f32.mrb[31].mxu0 }
 0x131   :  { %v916_v11 = vadd.f32 %v915_v34, %v598_v10 }
 0x132   :  { %1141 = vst [vmem:[%s2605_s3 + $0x60] sm:$0xff] %v914_v9 }
 0x133   :  { %1142 = vst.msk [vmem:[%s2605_s3 + $0x68] sm:$0xff] %vm1129_vm1, %v916_v11  ;;  %v602_v13 = vpop.f32.mrb[14].mxu1  ;;  %v973_v60 = vpop.f32.mrb[32].mxu0 }
 0x134   :  { %v920_v15 = vadd.f32 %v919_v35, %v602_v13  ;;  %v604_v16 = vpop.f32.mrb[15].mxu1  ;;  %v975_v28 = vpop.f32.mrb[33].mxu0 }
 0x135   :  { %v922_v17 = vadd.f32 %v921_v37, %v604_v16 }
 0x136   :  { %1143 = vst [vmem:[%s2605_s3 + $0x70] sm:$0xff] %v920_v15 }
 0x137   :  { %1144 = vst.msk [vmem:[%s2605_s3 + $0x78] sm:$0xff] %vm1129_vm1, %v922_v17  ;;  %v608_v19 = vpop.f32.mrb[16].mxu1  ;;  %v979_v26 = vpop.f32.mrb[34].mxu0 }
 0x138   :  { %v926_v21 = vadd.f32 %v925_v40, %v608_v19  ;;  %v610_v23 = vpop.f32.mrb[17].mxu1  ;;  %v981_v33 = vpop.f32.mrb[35].mxu0 }
 0x139   :  { %v928_v24 = vadd.f32 %v927_v42, %v610_v23 }
 0x13a   :  { %1145 = vst [vmem:[%s2605_s3 + $0x80] sm:$0xff] %v926_v21 }
 0x13b   :  { %1146 = vst.msk [vmem:[%s2605_s3 + $0x88] sm:$0xff] %vm1129_vm1, %v928_v24  ;;  %v614_v27 = vpop.f32.mrb[18].mxu1  ;;  %v985_v37 = vpop.f32.mrb[36].mxu0 }
 0x13c   :  { %v932_v30 = vadd.f32 %v931_v46, %v614_v27  ;;  %v616_v31 = vpop.f32.mrb[19].mxu1  ;;  %v987_v38 = vpop.f32.mrb[37].mxu0 }
 0x13d   :  { %v934_v22 = vadd.f32 %v933_v48, %v616_v31 }
 0x13e   :  { %1147 = vst [vmem:[%s2605_s3 + $0x90] sm:$0xff] %v932_v30 }
 0x13f   :  { %1148 = vst.msk [vmem:[%s2605_s3 + $0x98] sm:$0xff] %vm1129_vm1, %v934_v22  ;;  %v620_v32 = vpop.f32.mrb[20].mxu1  ;;  %v991_v42 = vpop.f32.mrb[38].mxu0 }
 0x140   :  { %v938_v34 = vadd.f32 %v937_v52, %v620_v32  ;;  %v622_v35 = vpop.f32.mrb[21].mxu1  ;;  %v993_v44 = vpop.f32.mrb[39].mxu0 }
 0x141   :  { %v940_v36 = vadd.f32 %v939_v54, %v622_v35 }
 0x142   :  { %1149 = vst [vmem:[%s2605_s3 + $0xa0] sm:$0xff] %v938_v34 }
 0x143   :  { %1150 = vst.msk [vmem:[%s2605_s3 + $0xa8] sm:$0xff] %vm1129_vm1, %v940_v36  ;;  %v626_v25 = vpop.f32.mrb[22].mxu1  ;;  %v997_v48 = vpop.f32.mrb[40].mxu0 }
 0x144   :  { %v944_v39 = vadd.f32 %v943_v58, %v626_v25  ;;  %v628_v40 = vpop.f32.mrb[23].mxu1  ;;  %v999_v50 = vpop.f32.mrb[41].mxu0 }
 0x145   :  { %v946_v41 = vadd.f32 %v945_v29, %v628_v40 }
 0x146   :  { %1151 = vst [vmem:[%s2605_s3 + $0xb0] sm:$0xff] %v944_v39 }
 0x147   :  { %1152 = vst.msk [vmem:[%s2605_s3 + $0xb8] sm:$0xff] %vm1129_vm1, %v946_v41  ;;  %v632_v43 = vpop.f32.mrb[24].mxu1  ;;  %v1003_v54 = vpop.f32.mrb[42].mxu0 }
 0x148   :  { %v950_v45 = vadd.f32 %v949_v63, %v632_v43  ;;  %v634_v46 = vpop.f32.mrb[25].mxu1  ;;  %v1005_v56 = vpop.f32.mrb[43].mxu0 }
 0x149   :  { %v952_v47 = vadd.f32 %v951_v1, %v634_v46 }
 0x14a   :  { %1153 = vst [vmem:[%s2605_s3 + $0xc0] sm:$0xff] %v950_v45 }
 0x14b   :  { %1154 = vst.msk [vmem:[%s2605_s3 + $0xc8] sm:$0xff] %vm1129_vm1, %v952_v47  ;;  %v638_v49 = vpop.f32.mrb[26].mxu1  ;;  %v1009_v29 = vpop.f32.mrb[44].mxu0 }
 0x14c   :  { %v956_v51 = vadd.f32 %v955_v6, %v638_v49  ;;  %v640_v52 = vpop.f32.mrb[27].mxu1  ;;  %v1011_v3 = vpop.f32.mrb[45].mxu0 }
 0x14d   :  { %v958_v53 = vadd.f32 %v957_v8, %v640_v52 }
 0x14e   :  { %1155 = vst [vmem:[%s2605_s3 + $0xd0] sm:$0xff] %v956_v51 }
 0x14f   :  { %1156 = vst.msk [vmem:[%s2605_s3 + $0xd8] sm:$0xff] %vm1129_vm1, %v958_v53  ;;  %v644_v55 = vpop.f32.mrb[28].mxu1  ;;  %v1015_v1 = vpop.f32.mrb[46].mxu0 }
 0x150   :  { %v962_v57 = vadd.f32 %v961_v12, %v644_v55  ;;  %v646_v58 = vpop.f32.mrb[29].mxu1  ;;  %v1017_v4 = vpop.f32.mrb[47].mxu0 }
 0x151   :  { %v964_v59 = vadd.f32 %v963_v14, %v646_v58 }
 0x152   :  { %1157 = vst [vmem:[%s2605_s3 + $0xe0] sm:$0xff] %v962_v57 }
 0x153   :  { %1158 = vst.msk [vmem:[%s2605_s3 + $0xe8] sm:$0xff] %vm1129_vm1, %v964_v59  ;;  %v650_v61 = vpop.f32.mrb[30].mxu1  ;;  %v1021_v8 = vpop.f32.mrb[48].mxu0 }
 0x154   :  { %v968_v62 = vadd.f32 %v967_v18, %v650_v61  ;;  %v652_v63 = vpop.f32.mrb[31].mxu1  ;;  %v1023_v10 = vpop.f32.mrb[49].mxu0 }
 0x155   :  { %v970_v0 = vadd.f32 %v969_v20, %v652_v63 }
 0x156   :  { %1159 = vst [vmem:[%s2605_s3 + $0xf0] sm:$0xff] %v968_v62 }
 0x157   :  { %1160 = vst.msk [vmem:[%s2605_s3 + $0xf8] sm:$0xff] %vm1129_vm1, %v970_v0  ;;  %v656_v2 = vpop.f32.mrb[32].mxu1  ;;  %v1027_v14 = vpop.f32.mrb[50].mxu0 }
 0x158   :  { %v974_v5 = vadd.f32 %v973_v60, %v656_v2  ;;  %v658_v6 = vpop.f32.mrb[33].mxu1  ;;  %v1029_v16 = vpop.f32.mrb[51].mxu0 }
 0x159   :  { %v976_v7 = vadd.f32 %v975_v28, %v658_v6 }
 0x15a   :  { %1161 = vst [vmem:[%s2605_s3 + $0x100] sm:$0xff] %v974_v5 }
 0x15b   :  { %1162 = vst.msk [vmem:[%s2605_s3 + $0x108] sm:$0xff] %vm1129_vm1, %v976_v7  ;;  %v662_v9 = vpop.f32.mrb[34].mxu1  ;;  %v1033_v20 = vpop.f32.mrb[52].mxu0 }
 0x15c   :  { %v980_v11 = vadd.f32 %v979_v26, %v662_v9  ;;  %v664_v12 = vpop.f32.mrb[35].mxu1  ;;  %v1035_v23 = vpop.f32.mrb[53].mxu0 }
 0x15d   :  { %v982_v13 = vadd.f32 %v981_v33, %v664_v12 }
 0x15e   :  { %1163 = vst [vmem:[%s2605_s3 + $0x110] sm:$0xff] %v980_v11 }
 0x15f   :  { %1164 = vst.msk [vmem:[%s2605_s3 + $0x118] sm:$0xff] %vm1129_vm1, %v982_v13  ;;  %v668_v15 = vpop.f32.mrb[36].mxu1  ;;  %v1039_v28 = vpop.f32.mrb[54].mxu0 }
 0x160   :  { %v986_v17 = vadd.f32 %v985_v37, %v668_v15  ;;  %v670_v18 = vpop.f32.mrb[37].mxu1  ;;  %v1041_v31 = vpop.f32.mrb[55].mxu0 }
 0x161   :  { %v988_v19 = vadd.f32 %v987_v38, %v670_v18 }
 0x162   :  { %1165 = vst [vmem:[%s2605_s3 + $0x120] sm:$0xff] %v986_v17 }
 0x163   :  { %1166 = vst.msk [vmem:[%s2605_s3 + $0x128] sm:$0xff] %vm1129_vm1, %v988_v19  ;;  %v674_v21 = vpop.f32.mrb[38].mxu1  ;;  %v1045_v33 = vpop.f32.mrb[56].mxu0 }
 0x164   :  { %v992_v24 = vadd.f32 %v991_v42, %v674_v21  ;;  %v676_v60 = vpop.f32.mrb[39].mxu1  ;;  %v1047_v35 = vpop.f32.mrb[57].mxu0 }
 0x165   :  { %v994_v27 = vadd.f32 %v993_v44, %v676_v60 }
 0x166   :  { %1167 = vst [vmem:[%s2605_s3 + $0x130] sm:$0xff] %v992_v24 }
 0x167   :  { %1168 = vst.msk [vmem:[%s2605_s3 + $0x138] sm:$0xff] %vm1129_vm1, %v994_v27  ;;  %v680_v30 = vpop.f32.mrb[40].mxu1  ;;  %v1051_v38 = vpop.f32.mrb[58].mxu0 }
 0x168   :  { %v998_v22 = vadd.f32 %v997_v48, %v680_v30  ;;  %v682_v26 = vpop.f32.mrb[41].mxu1  ;;  %v1053_v40 = vpop.f32.mrb[59].mxu0 }
 0x169   :  { %v1000_v32 = vadd.f32 %v999_v50, %v682_v26 }
 0x16a   :  { %1169 = vst [vmem:[%s2605_s3 + $0x140] sm:$0xff] %v998_v22 }
 0x16b   :  { %1170 = vst.msk [vmem:[%s2605_s3 + $0x148] sm:$0xff] %vm1129_vm1, %v1000_v32  ;;  %v686_v34 = vpop.f32.mrb[42].mxu1  ;;  %v1057_v44 = vpop.f32.mrb[60].mxu0 }
 0x16c   :  { %v1004_v36 = vadd.f32 %v1003_v54, %v686_v34  ;;  %v688_v37 = vpop.f32.mrb[43].mxu1  ;;  %v1059_v46 = vpop.f32.mrb[61].mxu0 }
 0x16d   :  { %v1006_v25 = vadd.f32 %v1005_v56, %v688_v37 }
 0x16e   :  { %1171 = vst [vmem:[%s2605_s3 + $0x150] sm:$0xff] %v1004_v36 }
 0x16f   :  { %1172 = vst.msk [vmem:[%s2605_s3 + $0x158] sm:$0xff] %vm1129_vm1, %v1006_v25  ;;  %v692_v39 = vpop.f32.mrb[44].mxu1  ;;  %v1063_v50 = vpop.f32.mrb[62].mxu0 }
 0x170   :  { %v1010_v41 = vadd.f32 %v1009_v29, %v692_v39  ;;  %v694_v42 = vpop.f32.mrb[45].mxu1  ;;  %v1065_v52 = vpop.f32.mrb[63].mxu0 }
 0x171   :  { %v1012_v43 = vadd.f32 %v1011_v3, %v694_v42 }
 0x172   :  { %1173 = vst [vmem:[%s2605_s3 + $0x160] sm:$0xff] %v1010_v41 }
 0x173   :  { %1174 = vst.msk [vmem:[%s2605_s3 + $0x168] sm:$0xff] %vm1129_vm1, %v1012_v43  ;;  %v698_v45 = vpop.f32.mrb[46].mxu1  ;;  %v1069_v56 = vpop.f32.mrb[64].mxu0 }
 0x174   :  { %v1016_v47 = vadd.f32 %v1015_v1, %v698_v45  ;;  %v700_v48 = vpop.f32.mrb[47].mxu1  ;;  %v1071_v58 = vpop.f32.mrb[65].mxu0 }
 0x175   :  { %v1018_v49 = vadd.f32 %v1017_v4, %v700_v48 }
 0x176   :  { %1175 = vst [vmem:[%s2605_s3 + $0x170] sm:$0xff] %v1016_v47 }
 0x177   :  { %1176 = vst.msk [vmem:[%s2605_s3 + $0x178] sm:$0xff] %vm1129_vm1, %v1018_v49  ;;  %v704_v51 = vpop.f32.mrb[48].mxu1  ;;  %v1075_v3 = vpop.f32.mrb[66].mxu0 }
 0x178   :  { %v1022_v53 = vadd.f32 %v1021_v8, %v704_v51  ;;  %v706_v54 = vpop.f32.mrb[49].mxu1  ;;  %v1077_v63 = vpop.f32.mrb[67].mxu0 }
 0x179   :  { %v1024_v55 = vadd.f32 %v1023_v10, %v706_v54 }
 0x17a   :  { %1177 = vst [vmem:[%s2605_s3 + $0x180] sm:$0xff] %v1022_v53 }
 0x17b   :  { %1178 = vst.msk [vmem:[%s2605_s3 + $0x188] sm:$0xff] %vm1129_vm1, %v1024_v55  ;;  %v710_v57 = vpop.f32.mrb[50].mxu1  ;;  %v1081_v4 = vpop.f32.mrb[68].mxu0 }
 0x17c   :  { %v1028_v59 = vadd.f32 %v1027_v14, %v710_v57  ;;  %v712_v29 = vpop.f32.mrb[51].mxu1  ;;  %v1083_v6 = vpop.f32.mrb[69].mxu0 }
 0x17d   :  { %v1030_v61 = vadd.f32 %v1029_v16, %v712_v29 }
 0x17e   :  { %1179 = vst [vmem:[%s2605_s3 + $0x190] sm:$0xff] %v1028_v59 }
 0x17f   :  { %1180 = vst.msk [vmem:[%s2605_s3 + $0x198] sm:$0xff] %vm1129_vm1, %v1030_v61  ;;  %v716_v62 = vpop.f32.mrb[52].mxu1  ;;  %v1087_v10 = vpop.f32.mrb[70].mxu0 }
 0x180   :  { %v1034_v0 = vadd.f32 %v1033_v20, %v716_v62  ;;  %v718_v1 = vpop.f32.mrb[53].mxu1  ;;  %v1089_v12 = vpop.f32.mrb[71].mxu0 }
 0x181   :  { %v1036_v2 = vadd.f32 %v1035_v23, %v718_v1 }
 0x182   :  { %1181 = vst [vmem:[%s2605_s3 + $0x1a0] sm:$0xff] %v1034_v0 }
 0x183   :  { %1182 = vst.msk [vmem:[%s2605_s3 + $0x1a8] sm:$0xff] %vm1129_vm1, %v1036_v2  ;;  %v722_v5 = vpop.f32.mrb[54].mxu1  ;;  %v1093_v16 = vpop.f32.mrb[72].mxu0 }
 0x184   :  { %v1040_v7 = vadd.f32 %v1039_v28, %v722_v5  ;;  %v724_v8 = vpop.f32.mrb[55].mxu1  ;;  %v1095_v18 = vpop.f32.mrb[73].mxu0 }
 0x185   :  { %v1042_v9 = vadd.f32 %v1041_v31, %v724_v8 }
 0x186   :  { %1183 = vst [vmem:[%s2605_s3 + $0x1b0] sm:$0xff] %v1040_v7 }
 0x187   :  { %1184 = vst.msk [vmem:[%s2605_s3 + $0x1b8] sm:$0xff] %vm1129_vm1, %v1042_v9  ;;  %v728_v11 = vpop.f32.mrb[56].mxu1  ;;  %v1099_v23 = vpop.f32.mrb[74].mxu0 }
 0x188   :  { %v1046_v13 = vadd.f32 %v1045_v33, %v728_v11  ;;  %v730_v14 = vpop.f32.mrb[57].mxu1  ;;  %v1101_v60 = vpop.f32.mrb[75].mxu0 }
 0x189   :  { %v1048_v15 = vadd.f32 %v1047_v35, %v730_v14 }
 0x18a   :  { %1185 = vst [vmem:[%s2605_s3 + $0x1c0] sm:$0xff] %v1046_v13 }
 0x18b   :  { %1186 = vst.msk [vmem:[%s2605_s3 + $0x1c8] sm:$0xff] %vm1129_vm1, %v1048_v15  ;;  %v734_v17 = vpop.f32.mrb[58].mxu1  ;;  %v1105_v31 = vpop.f32.mrb[76].mxu0 }
 0x18c   :  { %v1052_v19 = vadd.f32 %v1051_v38, %v734_v17  ;;  %v736_v20 = vpop.f32.mrb[59].mxu1  ;;  %v1107_v26 = vpop.f32.mrb[77].mxu0 }
 0x18d   :  { %v1054_v21 = vadd.f32 %v1053_v40, %v736_v20 }
 0x18e   :  { %1187 = vst [vmem:[%s2605_s3 + $0x1d0] sm:$0xff] %v1052_v19 }
 0x18f   :  { %1188 = vst.msk [vmem:[%s2605_s3 + $0x1d8] sm:$0xff] %vm1129_vm1, %v1054_v21  ;;  %v740_v24 = vpop.f32.mrb[60].mxu1  ;;  %v1111_v35 = vpop.f32.mrb[78].mxu0 }
 0x190   :  { %v1058_v27 = vadd.f32 %v1057_v44, %v740_v24  ;;  %v742_v28 = vpop.f32.mrb[61].mxu1  ;;  %v1113_v37 = vpop.f32.mrb[79].mxu0 }
 0x191   :  { %v1060_v30 = vadd.f32 %v1059_v46, %v742_v28 }
 0x192   :  { %1189 = vst [vmem:[%s2605_s3 + $0x1e0] sm:$0xff] %v1058_v27 }
 0x193   :  { %1190 = vst.msk [vmem:[%s2605_s3 + $0x1e8] sm:$0xff] %vm1129_vm1, %v1060_v30  ;;  %v746_v22 = vpop.f32.mrb[62].mxu1  ;;  %v1117_v40 = vpop.f32.mrb[80].mxu0 }
 0x194   :  { %v1064_v32 = vadd.f32 %v1063_v50, %v746_v22  ;;  %v748_v33 = vpop.f32.mrb[63].mxu1  ;;  %v1119_v42 = vpop.f32.mrb[81].mxu0 }
 0x195   :  { %v1066_v34 = vadd.f32 %v1065_v52, %v748_v33 }
 0x196   :  { %1191 = vst [vmem:[%s2605_s3 + $0x1f0] sm:$0xff] %v1064_v32 }
 0x197   :  { %1192 = vst.msk [vmem:[%s2605_s3 + $0x1f8] sm:$0xff] %vm1129_vm1, %v1066_v34  ;;  %v752_v36 = vpop.f32.mrb[64].mxu1  ;;  %v1123_v46 = vpop.f32.mrb[82].mxu0 }
 0x198   :  { %v1070_v25 = vadd.f32 %v1069_v56, %v752_v36  ;;  %v754_v38 = vpop.f32.mrb[65].mxu1  ;;  %v1125_v48 = vpop.f32.mrb[83].mxu0 }
 0x199   :  { %v1072_v39 = vadd.f32 %v1071_v58, %v754_v38 }
 0x19a   :  { %1193 = vst [vmem:[%s2605_s3 + $0x200] sm:$0xff] %v1070_v25 }
 0x19b   :  { %1194 = vst.msk [vmem:[%s2605_s3 + $0x208] sm:$0xff] %vm1129_vm1, %v1072_v39  ;;  %v758_v41 = vpop.f32.mrb[66].mxu1 }
 0x19c   :  { %v1076_v43 = vadd.f32 %v1075_v3, %v758_v41  ;;  %v760_v44 = vpop.f32.mrb[67].mxu1 }
 0x19d   :  { %v1078_v45 = vadd.f32 %v1077_v63, %v760_v44 }
 0x19e   :  { %1195 = vst [vmem:[%s2605_s3 + $0x210] sm:$0xff] %v1076_v43 }
 0x19f   :  { %1196 = vst.msk [vmem:[%s2605_s3 + $0x218] sm:$0xff] %vm1129_vm1, %v1078_v45  ;;  %v764_v47 = vpop.f32.mrb[68].mxu1 }
 0x1a0   :  { %v1082_v49 = vadd.f32 %v1081_v4, %v764_v47  ;;  %v766_v50 = vpop.f32.mrb[69].mxu1 }
 0x1a1   :  { %v1084_v51 = vadd.f32 %v1083_v6, %v766_v50 }
 0x1a2   :  { %1197 = vst [vmem:[%s2605_s3 + $0x220] sm:$0xff] %v1082_v49 }
 0x1a3   :  { %1198 = vst.msk [vmem:[%s2605_s3 + $0x228] sm:$0xff] %vm1129_vm1, %v1084_v51  ;;  %v770_v52 = vpop.f32.mrb[70].mxu1 }
 0x1a4   :  { %v1088_v53 = vadd.f32 %v1087_v10, %v770_v52  ;;  %v772_v54 = vpop.f32.mrb[71].mxu1 }
 0x1a5   :  { %v1090_v55 = vadd.f32 %v1089_v12, %v772_v54 }
 0x1a6   :  { %1199 = vst [vmem:[%s2605_s3 + $0x230] sm:$0xff] %v1088_v53 }
 0x1a7   :  { %1200 = vst.msk [vmem:[%s2605_s3 + $0x238] sm:$0xff] %vm1129_vm1, %v1090_v55  ;;  %v776_v56 = vpop.f32.mrb[72].mxu1 }
 0x1a8   :  { %v1094_v57 = vadd.f32 %v1093_v16, %v776_v56  ;;  %v778_v58 = vpop.f32.mrb[73].mxu1 }
 0x1a9   :  { %v1096_v59 = vadd.f32 %v1095_v18, %v778_v58 }
 0x1aa   :  { %1201 = vst [vmem:[%s2605_s3 + $0x240] sm:$0xff] %v1094_v57 }
 0x1ab   :  { %1202 = vst.msk [vmem:[%s2605_s3 + $0x248] sm:$0xff] %vm1129_vm1, %v1096_v59  ;;  %v782_v29 = vpop.f32.mrb[74].mxu1 }
 0x1ac   :  { %v1100_v61 = vadd.f32 %v1099_v23, %v782_v29  ;;  %v784_v3 = vpop.f32.mrb[75].mxu1 }
 0x1ad   :  { %v1102_v62 = vadd.f32 %v1101_v60, %v784_v3 }
 0x1ae   :  { %1203 = vst [vmem:[%s2605_s3 + $0x250] sm:$0xff] %v1100_v61 }
 0x1af   :  { %1204 = vst.msk [vmem:[%s2605_s3 + $0x258] sm:$0xff] %vm1129_vm1, %v1102_v62  ;;  %v788_v63 = vpop.f32.mrb[76].mxu1 }
 0x1b0   :  { %v1106_v0 = vadd.f32 %v1105_v31, %v788_v63  ;;  %v790_v1 = vpop.f32.mrb[77].mxu1 }
 0x1b1   :  { %v1108_v2 = vadd.f32 %v1107_v26, %v790_v1 }
 0x1b2   :  { %1205 = vst [vmem:[%s2605_s3 + $0x260] sm:$0xff] %v1106_v0 }
 0x1b3   :  { %1206 = vst.msk [vmem:[%s2605_s3 + $0x268] sm:$0xff] %vm1129_vm1, %v1108_v2  ;;  %v794_v4 = vpop.f32.mrb[78].mxu1 }
 0x1b4   :  { %v1112_v5 = vadd.f32 %v1111_v35, %v794_v4  ;;  %v796_v6 = vpop.f32.mrb[79].mxu1 }
 0x1b5   :  { %v1114_v7 = vadd.f32 %v1113_v37, %v796_v6 }
 0x1b6   :  { %1207 = vst [vmem:[%s2605_s3 + $0x270] sm:$0xff] %v1112_v5 }
 0x1b7   :  { %1208 = vst.msk [vmem:[%s2605_s3 + $0x278] sm:$0xff] %vm1129_vm1, %v1114_v7  ;;  %v800_v8 = vpop.f32.mrb[80].mxu1 }
 0x1b8   :  { %v1118_v9 = vadd.f32 %v1117_v40, %v800_v8  ;;  %v802_v10 = vpop.f32.mrb[81].mxu1 }
 0x1b9   :  { %v1120_v11 = vadd.f32 %v1119_v42, %v802_v10 }
 0x1ba   :  { %1209 = vst [vmem:[%s2605_s3 + $0x280] sm:$0xff] %v1118_v9 }
 0x1bb   :  { %1210 = vst.msk [vmem:[%s2605_s3 + $0x288] sm:$0xff] %vm1129_vm1, %v1120_v11  ;;  %v806_v12 = vpop.f32.mrb[82].mxu1 }
 0x1bc   :  { %v1124_v13 = vadd.f32 %v1123_v46, %v806_v12  ;;  %v808_v14 = vpop.f32.mrb[83].mxu1 }
 0x1bd   :  { %v1126_v15 = vadd.f32 %v1125_v48, %v808_v14 }
 0x1be   :  { %1211 = vst [vmem:[%s2605_s3 + $0x290] sm:$0xff] %v1124_v13 }
 0x1bf   :  { %1212 = vst.msk [vmem:[%s2605_s3 + $0x298] sm:$0xff] %vm1129_vm1, %v1126_v15 }

</bundles_post_ra>
